<compile_context>
chip_gen: v7x
topology: tpu7x:2x2x1
jax: 0.10.0
libtpu: 0.0.40
codegen_flags: <defaults>
</compile_context>

<pallas_src>
import functools

import numpy as np
import jax
import jax.numpy as jnp
from jax import lax
from jax.experimental import pallas as pl
from jax.experimental.pallas import tpu as pltpu

_VMEM = pl.BlockSpec(memory_space=pltpu.MemorySpace.VMEM)
_K = 5  # every conv in Lenet5 is 5x5


# ----------------------------- Pallas kernel -------------------------------

def _lenet5_kernel(x1_ref, b1_ref, c1_ref, p1r_ref, p1c_ref,
                   b2_ref, c2_ref, p2r_ref, p2c_ref,
                   b3_ref, c3_ref, gr_ref, gc_ref,
                   wl1_ref, bl1_ref, wl2_ref, bl2_ref,
                   out_ref, act2_ref, act3_ref):
    """Whole Lenet5 forward, VMEM-resident, all layers as small 2-D matmuls."""
    dot = functools.partial(jnp.dot, preferred_element_type=jnp.float32)

    def conv_relu(x_ref, band_ref, bias_ref):
        # x_ref   : (rows + K-1, W*Ci)   activation slab (+K-1 spare rows)
        # band_ref: (K, W*Ci, Wo*Co)     banded weight matrices (one per ki)
        # bias_ref: (1, Wo*Co)
        k = band_ref.shape[0]
        rows = x_ref.shape[0] - (k - 1)
        acc = dot(x_ref[0:rows, :], band_ref[0])
        for ki in range(1, k):                  # K shifted-row matmuls (unrolled)
            acc = acc + dot(x_ref[ki:ki + rows, :], band_ref[ki])
        return jnp.maximum(acc + bias_ref[...], 0.0)   # bias + ReLU epilogue

    # conv1 ('same' padding) + ReLU ........................ (N*Hb1, Wo1*C1)
    a1 = conv_relu(x1_ref, b1_ref, c1_ref)
    # AvgPool2d(2): row-pool matmul then lane-pool matmul; the row-pool matrix
    # also appends the K-1 zero rows needed by the next conv's shifted reads.
    act2_ref[...] = dot(dot(p1r_ref[...], a1), p1c_ref[...])

    # conv2 ('valid') + ReLU ............................... (N*Hb2, Wo2*C2)
    a2 = conv_relu(act2_ref, b2_ref, c2_ref)
    act3_ref[...] = dot(dot(p2r_ref[...], a2), p2c_ref[...])

    # conv3 ('valid') + ReLU ............................... (N*Hb3, Wo3*C3)
    a3 = conv_relu(act3_ref, b3_ref, c3_ref)

    # AdaptiveAvgPool2d(1) + Flatten as two constant matmuls ..... (N, C3)
    feats = dot(dot(gr_ref[...], a3), gc_ref[...])

    # Linear(16, latent)  then  lin2: Linear(latent, num_classes)
    hid = dot(feats, wl1_ref[...]) + bl1_ref[...]
    out_ref[...] = dot(hid, wl2_ref[...]) + bl2_ref[...]


# ----------------------- host-side weight / constant prep -------------------

def _band_matrices(wgt, w_in, w_out):
    """OIHW conv weight (Co,Ci,K,K) -> (K, w_in*Ci, w_out*Co) banded operands.

    B[ki][(win*Ci+ci), (wout*Co+co)] = wgt[co, ci, ki, win-wout] for
    0 <= win-wout < K, so   conv = sum_ki  X[rows shifted by ki] @ B[ki]
    with X rows indexed (n, h) and lanes (w, ci) channel-minor.
    """
    co, ci, ksz, _ = wgt.shape
    shift = np.stack([np.eye(w_in, w_out, k=-kj, dtype=np.float32)
                      for kj in range(ksz)])                  # (K, Win, Wout)
    b = jnp.einsum("jxy,oikj->kxiyo", shift, wgt.astype(jnp.float32))
    return b.reshape(ksz, w_in * ci, w_out * co)


def _row_pool(n, hb_in, extra):
    """Per-sample 2->1 row averaging (0.5 factor) + `extra` trailing zero rows."""
    q = 0.5 * np.kron(np.eye(hb_in // 2), np.ones((1, 2)))
    m = np.kron(np.eye(n), q)
    return np.concatenate([m, np.zeros((extra, n * hb_in))]).astype(np.float32)


def _col_pool(w_out, c):
    """Per-channel 2->1 lane averaging (0.5 factor), channels lane-minor."""
    a = np.kron(np.eye(w_out // 2), np.ones((2, 1)))
    return (0.5 * np.kron(a, np.eye(c))).astype(np.float32)


def _global_row(n, hb, ho):
    """(N, N*hb): mean over the `ho` valid rows of each sample's row block."""
    row = np.zeros((1, hb), np.float32)
    row[0, :ho] = 1.0 / ho
    return np.kron(np.eye(n), row).astype(np.float32)


def _global_col(wo, c):
    """(wo*c, c): mean over the `wo` spatial lane groups of each channel."""
    return np.kron(np.full((wo, 1), 1.0 / wo), np.eye(c)).astype(np.float32)


# ----------------------------- forward wrapper ------------------------------

def lenet5_forward(x, p):
    """Forward pass matching the PyTorch Lenet5 module (NCHW input)."""
    x = x.astype(jnp.float32)
    n, ci, h, w = x.shape
    co1, co2, co3 = p["w1"].shape[0], p["w2"].shape[0], p["w3"].shape[0]
    latent, ncls = p["wl1"].shape[0], p["wl2"].shape[0]

    pad = _K // 2
    hp, wp = h + 2 * pad, w + 2 * pad        # conv1 'same' padded input (32, 32)
    ho1, wo1 = h, w                          # conv1 output spatial (28, 28)
    hb1 = hp                                 # per-sample row block of conv1 out
    h1, w1 = ho1 // 2, wo1 // 2              # after pool1 (14, 14)
    hb2 = hb1 // 2
    ho2, wo2 = h1 - _K + 1, w1 - _K + 1      # conv2 output spatial (10, 10)
    h2, w2 = ho2 // 2, wo2 // 2              # after pool2 (5, 5)
    hb3 = hb2 // 2
    ho3, wo3 = h2 - _K + 1, w2 - _K + 1      # conv3 output spatial (1, 1)

    # input layout: NCHW -> (N*Hp, Wp*Ci), channels lane-minor, plus K-1
    # trailing zero rows so the shifted-row matmuls never read out of bounds.
    xp = jnp.pad(x, ((0, 0), (0, 0), (pad, pad), (pad, pad)))
    x1 = xp.transpose(0, 2, 3, 1).reshape(n * hp, wp * ci)
    x1 = jnp.pad(x1, ((0, _K - 1), (0, 0)))

    # tiny weight prep + constant pooling / selection matrices
    b1m = _band_matrices(p["w1"], wp, wo1)
    b2m = _band_matrices(p["w2"], w1, wo2)
    b3m = _band_matrices(p["w3"], w2, wo3)
    c1 = jnp.tile(p["b1"].astype(jnp.float32), wo1).reshape(1, wo1 * co1)
    c2 = jnp.tile(p["b2"].astype(jnp.float32), wo2).reshape(1, wo2 * co2)
    c3 = jnp.tile(p["b3"].astype(jnp.float32), wo3).reshape(1, wo3 * co3)
    p1r, p1c = _row_pool(n, hb1, _K - 1), _col_pool(wo1, co1)
    p2r, p2c = _row_pool(n, hb2, _K - 1), _col_pool(wo2, co2)
    gr, gc = _global_row(n, hb3, ho3), _global_col(wo3, co3)
    wl1 = p["wl1"].astype(jnp.float32).T
    bl1 = p["bl1"].astype(jnp.float32).reshape(1, latent)
    wl2 = p["wl2"].astype(jnp.float32).T
    bl2 = p["bl2"].astype(jnp.float32).reshape(1, ncls)

    operands = (x1, b1m, c1, p1r, p1c, b2m, c2, p2r, p2c, b3m, c3,
                gr, gc, wl1, bl1, wl2, bl2)
    return pl.pallas_call(
        _lenet5_kernel,
        out_shape=jax.ShapeDtypeStruct((n, ncls), jnp.float32),
        in_specs=[_VMEM] * len(operands),
        out_specs=_VMEM,
        scratch_shapes=[
            pltpu.VMEM((n * hb2 + _K - 1, w1 * co1), jnp.float32),  # pooled conv1
            pltpu.VMEM((n * hb3 + _K - 1, w2 * co2), jnp.float32),  # pooled conv2
        ],
    )(*operands)


# ----------------------------- pure-JAX reference ---------------------------

def lenet5_reference(x, p):
    def conv(x, w, b, pad):
        y = lax.conv_general_dilated(
            x, w, window_strides=(1, 1), padding=[(pad, pad), (pad, pad)],
            dimension_numbers=("NCHW", "OIHW", "NCHW"),
            precision=lax.Precision.HIGHEST)
        return jax.nn.relu(y + b[None, :, None, None])

    def pool(x):
        N, C, H, W = x.shape
        return x.reshape(N, C, H // 2, 2, W // 2, 2).mean(axis=(3, 5))

    x = conv(x, p["w1"], p["b1"], 2)
    x = pool(x)
    x = conv(x, p["w2"], p["b2"], 0)
    x = pool(x)
    x = conv(x, p["w3"], p["b3"], 0)
    x = x.mean(axis=(2, 3))
    x = x @ p["wl1"].T + p["bl1"]
    x = x @ p["wl2"].T + p["bl2"]
    return x


# ----------------------------- main -----------------------------------------

def init_params(key, input_channels=1, num_classes=10, latent_dim=32):
    ks = jax.random.split(key, 10)
    f32 = jnp.float32
    return {
        "w1": 0.2 * jax.random.normal(ks[0], (3, input_channels, 5, 5), f32),
        "b1": 0.1 * jax.random.normal(ks[1], (3,), f32),
        "w2": 0.2 * jax.random.normal(ks[2], (8, 3, 5, 5), f32),
        "b2": 0.1 * jax.random.normal(ks[3], (8,), f32),
        "w3": 0.2 * jax.random.normal(ks[4], (16, 8, 5, 5), f32),
        "b3": 0.1 * jax.random.normal(ks[5], (16,), f32),
        "wl1": 0.2 * jax.random.normal(ks[6], (latent_dim, 16), f32),
        "bl1": 0.1 * jax.random.normal(ks[7], (latent_dim,), f32),
        "wl2": 0.2 * jax.random.normal(ks[8], (num_classes, latent_dim), f32),
        "bl2": 0.1 * jax.random.normal(ks[9], (num_classes,), f32),
    }


if __name__ == "__main__":
    key = jax.random.PRNGKey(0)
    k_x, k_p = jax.random.split(key)
    # Smallest spatial size compatible with the two 'valid' 5x5 convs: 28x28.
    x = jax.random.normal(k_x, (2, 1, 28, 28), jnp.float32)
    params = init_params(k_p)

    logits = jax.block_until_ready(jax.jit(lenet5_forward)(x, params))
    assert logits.shape == (2, 10) and logits.dtype == jnp.float32

    ref = jax.block_until_ready(jax.jit(lenet5_reference)(x, params))
    assert jnp.allclose(logits, ref, atol=1e-2, rtol=1e-2), (
        f"max abs err {jnp.max(jnp.abs(logits - ref))}")

    print("KERNEL_OK")
</pallas_src>

<mosaic_0001>
module attributes {stable_mosaic.version = 11 : i64} {
  func.func @_lenet5_kernel(%arg0: memref<68x32xf32, #tpu.memory_space<vmem>>, %arg1: memref<5x32x84xf32, #tpu.memory_space<vmem>>, %arg2: memref<1x84xf32, #tpu.memory_space<vmem>>, %arg3: memref<36x64xf32, #tpu.memory_space<vmem>>, %arg4: memref<84x42xf32, #tpu.memory_space<vmem>>, %arg5: memref<5x42x80xf32, #tpu.memory_space<vmem>>, %arg6: memref<1x80xf32, #tpu.memory_space<vmem>>, %arg7: memref<20x32xf32, #tpu.memory_space<vmem>>, %arg8: memref<80x40xf32, #tpu.memory_space<vmem>>, %arg9: memref<5x40x16xf32, #tpu.memory_space<vmem>>, %arg10: memref<1x16xf32, #tpu.memory_space<vmem>>, %arg11: memref<2x16xf32, #tpu.memory_space<vmem>>, %arg12: memref<16x16xf32, #tpu.memory_space<vmem>>, %arg13: memref<16x32xf32, #tpu.memory_space<vmem>>, %arg14: memref<1x32xf32, #tpu.memory_space<vmem>>, %arg15: memref<32x10xf32, #tpu.memory_space<vmem>>, %arg16: memref<1x10xf32, #tpu.memory_space<vmem>>, %arg17: memref<2x10xf32, #tpu.memory_space<vmem>>, %arg18: memref<36x42xf32, #tpu.memory_space<vmem>>, %arg19: memref<20x40xf32, #tpu.memory_space<vmem>>) attributes {dimension_semantics = [], scalar_prefetch = 0 : i64, scratch_operands = 2 : i64, tpu.core_type = #tpu.core_type<tc>} {
    %c0 = arith.constant 0 : index
    %c0_0 = arith.constant 0 : index
    %0 = vector.load %arg0[%c0, %c0_0] : memref<68x32xf32, #tpu.memory_space<vmem>>, vector<64x32xf32>
    %c0_1 = arith.constant 0 : index
    %c0_2 = arith.constant 0 : index
    %c0_3 = arith.constant 0 : index
    %1 = vector.load %arg1[%c0_1, %c0_2, %c0_3] : memref<5x32x84xf32, #tpu.memory_space<vmem>>, vector<1x32x84xf32>
    %2 = vector.shape_cast %1 : vector<1x32x84xf32> to vector<32x84xf32>
    %cst = arith.constant dense<0.000000e+00> : vector<64x84xf32>
    %3 = tpu.matmul %0, %2, %cst {dimension_numbers = #tpu.dot_dimension_numbers<[1], [0], [0], [1], [0, 0, 1, 1], [], []>} : vector<64x32xf32>, vector<32x84xf32>, vector<64x84xf32> -> vector<64x84xf32>
    %c1 = arith.constant 1 : index
    %c0_4 = arith.constant 0 : index
    %4 = vector.load %arg0[%c1, %c0_4] : memref<68x32xf32, #tpu.memory_space<vmem>>, vector<64x32xf32>
    %c1_5 = arith.constant 1 : index
    %c0_6 = arith.constant 0 : index
    %c0_7 = arith.constant 0 : index
    %5 = vector.load %arg1[%c1_5, %c0_6, %c0_7] : memref<5x32x84xf32, #tpu.memory_space<vmem>>, vector<1x32x84xf32>
    %6 = vector.shape_cast %5 : vector<1x32x84xf32> to vector<32x84xf32>
    %cst_8 = arith.constant dense<0.000000e+00> : vector<64x84xf32>
    %7 = tpu.matmul %4, %6, %cst_8 {dimension_numbers = #tpu.dot_dimension_numbers<[1], [0], [0], [1], [0, 0, 1, 1], [], []>} : vector<64x32xf32>, vector<32x84xf32>, vector<64x84xf32> -> vector<64x84xf32>
    %8 = arith.addf %3, %7 : vector<64x84xf32>
    %c2 = arith.constant 2 : index
    %c0_9 = arith.constant 0 : index
    %9 = vector.load %arg0[%c2, %c0_9] : memref<68x32xf32, #tpu.memory_space<vmem>>, vector<64x32xf32>
    %c2_10 = arith.constant 2 : index
    %c0_11 = arith.constant 0 : index
    %c0_12 = arith.constant 0 : index
    %10 = vector.load %arg1[%c2_10, %c0_11, %c0_12] : memref<5x32x84xf32, #tpu.memory_space<vmem>>, vector<1x32x84xf32>
    %11 = vector.shape_cast %10 : vector<1x32x84xf32> to vector<32x84xf32>
    %cst_13 = arith.constant dense<0.000000e+00> : vector<64x84xf32>
    %12 = tpu.matmul %9, %11, %cst_13 {dimension_numbers = #tpu.dot_dimension_numbers<[1], [0], [0], [1], [0, 0, 1, 1], [], []>} : vector<64x32xf32>, vector<32x84xf32>, vector<64x84xf32> -> vector<64x84xf32>
    %13 = arith.addf %8, %12 : vector<64x84xf32>
    %c3 = arith.constant 3 : index
    %c0_14 = arith.constant 0 : index
    %14 = vector.load %arg0[%c3, %c0_14] : memref<68x32xf32, #tpu.memory_space<vmem>>, vector<64x32xf32>
    %c3_15 = arith.constant 3 : index
    %c0_16 = arith.constant 0 : index
    %c0_17 = arith.constant 0 : index
    %15 = vector.load %arg1[%c3_15, %c0_16, %c0_17] : memref<5x32x84xf32, #tpu.memory_space<vmem>>, vector<1x32x84xf32>
    %16 = vector.shape_cast %15 : vector<1x32x84xf32> to vector<32x84xf32>
    %cst_18 = arith.constant dense<0.000000e+00> : vector<64x84xf32>
    %17 = tpu.matmul %14, %16, %cst_18 {dimension_numbers = #tpu.dot_dimension_numbers<[1], [0], [0], [1], [0, 0, 1, 1], [], []>} : vector<64x32xf32>, vector<32x84xf32>, vector<64x84xf32> -> vector<64x84xf32>
    %18 = arith.addf %13, %17 : vector<64x84xf32>
    %c4 = arith.constant 4 : index
    %c0_19 = arith.constant 0 : index
    %19 = vector.load %arg0[%c4, %c0_19] : memref<68x32xf32, #tpu.memory_space<vmem>>, vector<64x32xf32>
    %c4_20 = arith.constant 4 : index
    %c0_21 = arith.constant 0 : index
    %c0_22 = arith.constant 0 : index
    %20 = vector.load %arg1[%c4_20, %c0_21, %c0_22] : memref<5x32x84xf32, #tpu.memory_space<vmem>>, vector<1x32x84xf32>
    %21 = vector.shape_cast %20 : vector<1x32x84xf32> to vector<32x84xf32>
    %cst_23 = arith.constant dense<0.000000e+00> : vector<64x84xf32>
    %22 = tpu.matmul %19, %21, %cst_23 {dimension_numbers = #tpu.dot_dimension_numbers<[1], [0], [0], [1], [0, 0, 1, 1], [], []>} : vector<64x32xf32>, vector<32x84xf32>, vector<64x84xf32> -> vector<64x84xf32>
    %23 = arith.addf %18, %22 : vector<64x84xf32>
    %c0_24 = arith.constant 0 : index
    %c0_25 = arith.constant 0 : index
    %24 = vector.load %arg2[%c0_24, %c0_25] : memref<1x84xf32, #tpu.memory_space<vmem>>, vector<1x84xf32>
    %25 = vector.broadcast %24 : vector<1x84xf32> to vector<64x84xf32>
    %26 = arith.addf %23, %25 : vector<64x84xf32>
    %cst_26 = arith.constant 0.000000e+00 : f32
    %27 = vector.broadcast %cst_26 : f32 to vector<64x84xf32>
    %28 = arith.maximumf %26, %27 : vector<64x84xf32>
    %c0_27 = arith.constant 0 : index
    %c0_28 = arith.constant 0 : index
    %29 = vector.load %arg3[%c0_27, %c0_28] : memref<36x64xf32, #tpu.memory_space<vmem>>, vector<36x64xf32>
    %cst_29 = arith.constant dense<0.000000e+00> : vector<36x84xf32>
    %30 = tpu.matmul %29, %28, %cst_29 {dimension_numbers = #tpu.dot_dimension_numbers<[1], [0], [0], [1], [0, 0, 1, 1], [], []>} : vector<36x64xf32>, vector<64x84xf32>, vector<36x84xf32> -> vector<36x84xf32>
    %c0_30 = arith.constant 0 : index
    %c0_31 = arith.constant 0 : index
    %31 = vector.load %arg4[%c0_30, %c0_31] : memref<84x42xf32, #tpu.memory_space<vmem>>, vector<84x42xf32>
    %cst_32 = arith.constant dense<0.000000e+00> : vector<36x42xf32>
    %32 = tpu.matmul %30, %31, %cst_32 {dimension_numbers = #tpu.dot_dimension_numbers<[1], [0], [0], [1], [0, 0, 1, 1], [], []>} : vector<36x84xf32>, vector<84x42xf32>, vector<36x42xf32> -> vector<36x42xf32>
    %c0_33 = arith.constant 0 : index
    %c0_34 = arith.constant 0 : index
    %33 = vector.load %arg18[%c0_33, %c0_34] : memref<36x42xf32, #tpu.memory_space<vmem>>, vector<36x42xf32>
    tpu.vector_store %arg18[%c0_33, %c0_34], %32 {strides = array<i32>} : memref<36x42xf32, #tpu.memory_space<vmem>>, vector<36x42xf32>,
    %c0_35 = arith.constant 0 : index
    %c0_36 = arith.constant 0 : index
    %34 = vector.load %arg18[%c0_35, %c0_36] : memref<36x42xf32, #tpu.memory_space<vmem>>, vector<32x42xf32>
    %c0_37 = arith.constant 0 : index
    %c0_38 = arith.constant 0 : index
    %c0_39 = arith.constant 0 : index
    %35 = vector.load %arg5[%c0_37, %c0_38, %c0_39] : memref<5x42x80xf32, #tpu.memory_space<vmem>>, vector<1x42x80xf32>
    %36 = vector.shape_cast %35 : vector<1x42x80xf32> to vector<42x80xf32>
    %cst_40 = arith.constant dense<0.000000e+00> : vector<32x80xf32>
    %37 = tpu.matmul %34, %36, %cst_40 {dimension_numbers = #tpu.dot_dimension_numbers<[1], [0], [0], [1], [0, 0, 1, 1], [], []>} : vector<32x42xf32>, vector<42x80xf32>, vector<32x80xf32> -> vector<32x80xf32>
    %c1_41 = arith.constant 1 : index
    %c0_42 = arith.constant 0 : index
    %38 = vector.load %arg18[%c1_41, %c0_42] : memref<36x42xf32, #tpu.memory_space<vmem>>, vector<32x42xf32>
    %c1_43 = arith.constant 1 : index
    %c0_44 = arith.constant 0 : index
    %c0_45 = arith.constant 0 : index
    %39 = vector.load %arg5[%c1_43, %c0_44, %c0_45] : memref<5x42x80xf32, #tpu.memory_space<vmem>>, vector<1x42x80xf32>
    %40 = vector.shape_cast %39 : vector<1x42x80xf32> to vector<42x80xf32>
    %cst_46 = arith.constant dense<0.000000e+00> : vector<32x80xf32>
    %41 = tpu.matmul %38, %40, %cst_46 {dimension_numbers = #tpu.dot_dimension_numbers<[1], [0], [0], [1], [0, 0, 1, 1], [], []>} : vector<32x42xf32>, vector<42x80xf32>, vector<32x80xf32> -> vector<32x80xf32>
    %42 = arith.addf %37, %41 : vector<32x80xf32>
    %c2_47 = arith.constant 2 : index
    %c0_48 = arith.constant 0 : index
    %43 = vector.load %arg18[%c2_47, %c0_48] : memref<36x42xf32, #tpu.memory_space<vmem>>, vector<32x42xf32>
    %c2_49 = arith.constant 2 : index
    %c0_50 = arith.constant 0 : index
    %c0_51 = arith.constant 0 : index
    %44 = vector.load %arg5[%c2_49, %c0_50, %c0_51] : memref<5x42x80xf32, #tpu.memory_space<vmem>>, vector<1x42x80xf32>
    %45 = vector.shape_cast %44 : vector<1x42x80xf32> to vector<42x80xf32>
    %cst_52 = arith.constant dense<0.000000e+00> : vector<32x80xf32>
    %46 = tpu.matmul %43, %45, %cst_52 {dimension_numbers = #tpu.dot_dimension_numbers<[1], [0], [0], [1], [0, 0, 1, 1], [], []>} : vector<32x42xf32>, vector<42x80xf32>, vector<32x80xf32> -> vector<32x80xf32>
    %47 = arith.addf %42, %46 : vector<32x80xf32>
    %c3_53 = arith.constant 3 : index
    %c0_54 = arith.constant 0 : index
    %48 = vector.load %arg18[%c3_53, %c0_54] : memref<36x42xf32, #tpu.memory_space<vmem>>, vector<32x42xf32>
    %c3_55 = arith.constant 3 : index
    %c0_56 = arith.constant 0 : index
    %c0_57 = arith.constant 0 : index
    %49 = vector.load %arg5[%c3_55, %c0_56, %c0_57] : memref<5x42x80xf32, #tpu.memory_space<vmem>>, vector<1x42x80xf32>
    %50 = vector.shape_cast %49 : vector<1x42x80xf32> to vector<42x80xf32>
    %cst_58 = arith.constant dense<0.000000e+00> : vector<32x80xf32>
    %51 = tpu.matmul %48, %50, %cst_58 {dimension_numbers = #tpu.dot_dimension_numbers<[1], [0], [0], [1], [0, 0, 1, 1], [], []>} : vector<32x42xf32>, vector<42x80xf32>, vector<32x80xf32> -> vector<32x80xf32>
    %52 = arith.addf %47, %51 : vector<32x80xf32>
    %c4_59 = arith.constant 4 : index
    %c0_60 = arith.constant 0 : index
    %53 = vector.load %arg18[%c4_59, %c0_60] : memref<36x42xf32, #tpu.memory_space<vmem>>, vector<32x42xf32>
    %c4_61 = arith.constant 4 : index
    %c0_62 = arith.constant 0 : index
    %c0_63 = arith.constant 0 : index
    %54 = vector.load %arg5[%c4_61, %c0_62, %c0_63] : memref<5x42x80xf32, #tpu.memory_space<vmem>>, vector<1x42x80xf32>
    %55 = vector.shape_cast %54 : vector<1x42x80xf32> to vector<42x80xf32>
    %cst_64 = arith.constant dense<0.000000e+00> : vector<32x80xf32>
    %56 = tpu.matmul %53, %55, %cst_64 {dimension_numbers = #tpu.dot_dimension_numbers<[1], [0], [0], [1], [0, 0, 1, 1], [], []>} : vector<32x42xf32>, vector<42x80xf32>, vector<32x80xf32> -> vector<32x80xf32>
    %57 = arith.addf %52, %56 : vector<32x80xf32>
    %c0_65 = arith.constant 0 : index
    %c0_66 = arith.constant 0 : index
    %58 = vector.load %arg6[%c0_65, %c0_66] : memref<1x80xf32, #tpu.memory_space<vmem>>, vector<1x80xf32>
    %59 = vector.broadcast %58 : vector<1x80xf32> to vector<32x80xf32>
    %60 = arith.addf %57, %59 : vector<32x80xf32>
    %cst_67 = arith.constant 0.000000e+00 : f32
    %61 = vector.broadcast %cst_67 : f32 to vector<32x80xf32>
    %62 = arith.maximumf %60, %61 : vector<32x80xf32>
    %c0_68 = arith.constant 0 : index
    %c0_69 = arith.constant 0 : index
    %63 = vector.load %arg7[%c0_68, %c0_69] : memref<20x32xf32, #tpu.memory_space<vmem>>, vector<20x32xf32>
    %cst_70 = arith.constant dense<0.000000e+00> : vector<20x80xf32>
    %64 = tpu.matmul %63, %62, %cst_70 {dimension_numbers = #tpu.dot_dimension_numbers<[1], [0], [0], [1], [0, 0, 1, 1], [], []>} : vector<20x32xf32>, vector<32x80xf32>, vector<20x80xf32> -> vector<20x80xf32>
    %c0_71 = arith.constant 0 : index
    %c0_72 = arith.constant 0 : index
    %65 = vector.load %arg8[%c0_71, %c0_72] : memref<80x40xf32, #tpu.memory_space<vmem>>, vector<80x40xf32>
    %cst_73 = arith.constant dense<0.000000e+00> : vector<20x40xf32>
    %66 = tpu.matmul %64, %65, %cst_73 {dimension_numbers = #tpu.dot_dimension_numbers<[1], [0], [0], [1], [0, 0, 1, 1], [], []>} : vector<20x80xf32>, vector<80x40xf32>, vector<20x40xf32> -> vector<20x40xf32>
    %c0_74 = arith.constant 0 : index
    %c0_75 = arith.constant 0 : index
    %67 = vector.load %arg19[%c0_74, %c0_75] : memref<20x40xf32, #tpu.memory_space<vmem>>, vector<20x40xf32>
    tpu.vector_store %arg19[%c0_74, %c0_75], %66 {strides = array<i32>} : memref<20x40xf32, #tpu.memory_space<vmem>>, vector<20x40xf32>,
    %c0_76 = arith.constant 0 : index
    %c0_77 = arith.constant 0 : index
    %68 = vector.load %arg19[%c0_76, %c0_77] : memref<20x40xf32, #tpu.memory_space<vmem>>, vector<16x40xf32>
    %c0_78 = arith.constant 0 : index
    %c0_79 = arith.constant 0 : index
    %c0_80 = arith.constant 0 : index
    %69 = vector.load %arg9[%c0_78, %c0_79, %c0_80] : memref<5x40x16xf32, #tpu.memory_space<vmem>>, vector<1x40x16xf32>
    %70 = vector.shape_cast %69 : vector<1x40x16xf32> to vector<40x16xf32>
    %cst_81 = arith.constant dense<0.000000e+00> : vector<16x16xf32>
    %71 = tpu.matmul %68, %70, %cst_81 {dimension_numbers = #tpu.dot_dimension_numbers<[1], [0], [0], [1], [0, 0, 1, 1], [], []>} : vector<16x40xf32>, vector<40x16xf32>, vector<16x16xf32> -> vector<16x16xf32>
    %c1_82 = arith.constant 1 : index
    %c0_83 = arith.constant 0 : index
    %72 = vector.load %arg19[%c1_82, %c0_83] : memref<20x40xf32, #tpu.memory_space<vmem>>, vector<16x40xf32>
    %c1_84 = arith.constant 1 : index
    %c0_85 = arith.constant 0 : index
    %c0_86 = arith.constant 0 : index
    %73 = vector.load %arg9[%c1_84, %c0_85, %c0_86] : memref<5x40x16xf32, #tpu.memory_space<vmem>>, vector<1x40x16xf32>
    %74 = vector.shape_cast %73 : vector<1x40x16xf32> to vector<40x16xf32>
    %cst_87 = arith.constant dense<0.000000e+00> : vector<16x16xf32>
    %75 = tpu.matmul %72, %74, %cst_87 {dimension_numbers = #tpu.dot_dimension_numbers<[1], [0], [0], [1], [0, 0, 1, 1], [], []>} : vector<16x40xf32>, vector<40x16xf32>, vector<16x16xf32> -> vector<16x16xf32>
    %76 = arith.addf %71, %75 : vector<16x16xf32>
    %c2_88 = arith.constant 2 : index
    %c0_89 = arith.constant 0 : index
    %77 = vector.load %arg19[%c2_88, %c0_89] : memref<20x40xf32, #tpu.memory_space<vmem>>, vector<16x40xf32>
    %c2_90 = arith.constant 2 : index
    %c0_91 = arith.constant 0 : index
    %c0_92 = arith.constant 0 : index
    %78 = vector.load %arg9[%c2_90, %c0_91, %c0_92] : memref<5x40x16xf32, #tpu.memory_space<vmem>>, vector<1x40x16xf32>
    %79 = vector.shape_cast %78 : vector<1x40x16xf32> to vector<40x16xf32>
    %cst_93 = arith.constant dense<0.000000e+00> : vector<16x16xf32>
    %80 = tpu.matmul %77, %79, %cst_93 {dimension_numbers = #tpu.dot_dimension_numbers<[1], [0], [0], [1], [0, 0, 1, 1], [], []>} : vector<16x40xf32>, vector<40x16xf32>, vector<16x16xf32> -> vector<16x16xf32>
    %81 = arith.addf %76, %80 : vector<16x16xf32>
    %c3_94 = arith.constant 3 : index
    %c0_95 = arith.constant 0 : index
    %82 = vector.load %arg19[%c3_94, %c0_95] : memref<20x40xf32, #tpu.memory_space<vmem>>, vector<16x40xf32>
    %c3_96 = arith.constant 3 : index
    %c0_97 = arith.constant 0 : index
    %c0_98 = arith.constant 0 : index
    %83 = vector.load %arg9[%c3_96, %c0_97, %c0_98] : memref<5x40x16xf32, #tpu.memory_space<vmem>>, vector<1x40x16xf32>
    %84 = vector.shape_cast %83 : vector<1x40x16xf32> to vector<40x16xf32>
    %cst_99 = arith.constant dense<0.000000e+00> : vector<16x16xf32>
    %85 = tpu.matmul %82, %84, %cst_99 {dimension_numbers = #tpu.dot_dimension_numbers<[1], [0], [0], [1], [0, 0, 1, 1], [], []>} : vector<16x40xf32>, vector<40x16xf32>, vector<16x16xf32> -> vector<16x16xf32>
    %86 = arith.addf %81, %85 : vector<16x16xf32>
    %c4_100 = arith.constant 4 : index
    %c0_101 = arith.constant 0 : index
    %87 = vector.load %arg19[%c4_100, %c0_101] : memref<20x40xf32, #tpu.memory_space<vmem>>, vector<16x40xf32>
    %c4_102 = arith.constant 4 : index
    %c0_103 = arith.constant 0 : index
    %c0_104 = arith.constant 0 : index
    %88 = vector.load %arg9[%c4_102, %c0_103, %c0_104] : memref<5x40x16xf32, #tpu.memory_space<vmem>>, vector<1x40x16xf32>
    %89 = vector.shape_cast %88 : vector<1x40x16xf32> to vector<40x16xf32>
    %cst_105 = arith.constant dense<0.000000e+00> : vector<16x16xf32>
    %90 = tpu.matmul %87, %89, %cst_105 {dimension_numbers = #tpu.dot_dimension_numbers<[1], [0], [0], [1], [0, 0, 1, 1], [], []>} : vector<16x40xf32>, vector<40x16xf32>, vector<16x16xf32> -> vector<16x16xf32>
    %91 = arith.addf %86, %90 : vector<16x16xf32>
    %c0_106 = arith.constant 0 : index
    %c0_107 = arith.constant 0 : index
    %92 = vector.load %arg10[%c0_106, %c0_107] : memref<1x16xf32, #tpu.memory_space<vmem>>, vector<1x16xf32>
    %93 = vector.broadcast %92 : vector<1x16xf32> to vector<16x16xf32>
    %94 = arith.addf %91, %93 : vector<16x16xf32>
    %cst_108 = arith.constant 0.000000e+00 : f32
    %95 = vector.broadcast %cst_108 : f32 to vector<16x16xf32>
    %96 = arith.maximumf %94, %95 : vector<16x16xf32>
    %c0_109 = arith.constant 0 : index
    %c0_110 = arith.constant 0 : index
    %97 = vector.load %arg11[%c0_109, %c0_110] : memref<2x16xf32, #tpu.memory_space<vmem>>, vector<2x16xf32>
    %cst_111 = arith.constant dense<0.000000e+00> : vector<2x16xf32>
    %98 = tpu.matmul %97, %96, %cst_111 {dimension_numbers = #tpu.dot_dimension_numbers<[1], [0], [0], [1], [0, 0, 1, 1], [], []>} : vector<2x16xf32>, vector<16x16xf32>, vector<2x16xf32> -> vector<2x16xf32>
    %c0_112 = arith.constant 0 : index
    %c0_113 = arith.constant 0 : index
    %99 = vector.load %arg12[%c0_112, %c0_113] : memref<16x16xf32, #tpu.memory_space<vmem>>, vector<16x16xf32>
    %cst_114 = arith.constant dense<0.000000e+00> : vector<2x16xf32>
    %100 = tpu.matmul %98, %99, %cst_114 {dimension_numbers = #tpu.dot_dimension_numbers<[1], [0], [0], [1], [0, 0, 1, 1], [], []>} : vector<2x16xf32>, vector<16x16xf32>, vector<2x16xf32> -> vector<2x16xf32>
    %c0_115 = arith.constant 0 : index
    %c0_116 = arith.constant 0 : index
    %101 = vector.load %arg13[%c0_115, %c0_116] : memref<16x32xf32, #tpu.memory_space<vmem>>, vector<16x32xf32>
    %cst_117 = arith.constant dense<0.000000e+00> : vector<2x32xf32>
    %102 = tpu.matmul %100, %101, %cst_117 {dimension_numbers = #tpu.dot_dimension_numbers<[1], [0], [0], [1], [0, 0, 1, 1], [], []>} : vector<2x16xf32>, vector<16x32xf32>, vector<2x32xf32> -> vector<2x32xf32>
    %c0_118 = arith.constant 0 : index
    %c0_119 = arith.constant 0 : index
    %103 = vector.load %arg14[%c0_118, %c0_119] : memref<1x32xf32, #tpu.memory_space<vmem>>, vector<1x32xf32>
    %104 = vector.broadcast %103 : vector<1x32xf32> to vector<2x32xf32>
    %105 = arith.addf %102, %104 : vector<2x32xf32>
    %c0_120 = arith.constant 0 : index
    %c0_121 = arith.constant 0 : index
    %106 = vector.load %arg15[%c0_120, %c0_121] : memref<32x10xf32, #tpu.memory_space<vmem>>, vector<32x10xf32>
    %cst_122 = arith.constant dense<0.000000e+00> : vector<2x10xf32>
    %107 = tpu.matmul %105, %106, %cst_122 {dimension_numbers = #tpu.dot_dimension_numbers<[1], [0], [0], [1], [0, 0, 1, 1], [], []>} : vector<2x32xf32>, vector<32x10xf32>, vector<2x10xf32> -> vector<2x10xf32>
    %c0_123 = arith.constant 0 : index
    %c0_124 = arith.constant 0 : index
    %108 = vector.load %arg16[%c0_123, %c0_124] : memref<1x10xf32, #tpu.memory_space<vmem>>, vector<1x10xf32>
    %109 = vector.broadcast %108 : vector<1x10xf32> to vector<2x10xf32>
    %110 = arith.addf %107, %109 : vector<2x10xf32>
    %c0_125 = arith.constant 0 : index
    %c0_126 = arith.constant 0 : index
    %111 = vector.load %arg17[%c0_125, %c0_126] : memref<2x10xf32, #tpu.memory_space<vmem>>, vector<2x10xf32>
    tpu.vector_store %arg17[%c0_125, %c0_126], %110 {strides = array<i32>} : memref<2x10xf32, #tpu.memory_space<vmem>>, vector<2x10xf32>,
    return
  }
}

</mosaic_0001>

<bundles_post_ra>
// kernel: tile.14
= control target key start
LH: loop header
LB: loop body
LE: loop exit
PB: predicated region body
PF: predicated region fallthrough
CT: control target
= control target key end

     0   :  { %s40_s0 = inlined_call_operand.vmem [shape: f32[3], index: 0, kind: input, shape index: {}]   ;;  %s41_s1 = inlined_call_operand.vmem [shape: f32[28,3], index: 1, kind: output, shape index: {}]  }
   0x1   :  { %v4_v0 = vld [vmem:[%s40_s0] ss:$0 sm:$0xff] }
   0x2   :  { %5 = vst [vmem:[%s41_s1] sm:$0xff] %v4_v0  ;;  %12 = vst [vmem:[%s41_s1 + $0x8] sm:$0xff] %v4_v0 }
   0x3   :  { %13 = vst [vmem:[%s41_s1 + $0x10] sm:$0xff] %v4_v0  ;;  %14 = vst [vmem:[%s41_s1 + $0x18] sm:$0xff] %v4_v0 }

// kernel: tile.15
= control target key start
LH: loop header
LB: loop body
LE: loop exit
PB: predicated region body
PF: predicated region fallthrough
CT: control target
= control target key end

     0   :  { %s227_s10 = smov 81   ;;  %s228_s11 = smov 75   ;;  %vm3_vm0 = vcmask 23552   ;;  %vm9_vm1 = vcmask 687752   ;;  %vm15_vm2 = vcmask 663152   ;;  %vm21_vm3 = vcmask 638552   ;;  %s351_s0 = inlined_call_operand.vmem [shape: f32[28,3], index: 0, kind: input, shape index: {}]   ;;  %s352_s1 = inlined_call_operand.vmem [shape: f32[1,84], index: 1, kind: output, shape index: {}]  }
   0x1   :  { %v173_v0 = vld [vmem:[%s351_s0 + $0x1b] sm:$0x1]   ;;  %v175_v1 = vld [vmem:[%s351_s0 + $0x19] sm:$0x1]   ;;  %v174_v2 = vld [vmem:[%s351_s0 + $0x1a] sm:$0x1]  }
   0x2   :  { %7 = vrot.lane.b32.xlu0 %v173_v0, %s227_s10  ;;  %19 = vrot.lane.b32.xlu1 %v175_v1, %s228_s11  ;;  %v176_v3 = vld [vmem:[%s351_s0 + $0x18] sm:$0x1]   ;;  %s229_s16 = smov 78   ;;  %s230_s17 = smov 72   ;;  %v177_v4 = vld [vmem:[%s351_s0 + $0x17] sm:$0x1]  }
   0x3   :  { %v178_v5 = vld [vmem:[%s351_s0 + $0x16] sm:$0x1]   ;;  %s231_s22 = smov 69   ;;  %s232_s23 = smov 66   ;;  %v179_v6 = vld [vmem:[%s351_s0 + $0x15] sm:$0x1]  }
   0x4   :  { %v180_v7 = vld [vmem:[%s351_s0 + $0x14] sm:$0x1]   ;;  %s233_s28 = smov 63   ;;  %s234_s29 = smov 60   ;;  %v181_v8 = vld [vmem:[%s351_s0 + $0x13] sm:$0x1]  }
   0x5   :  { %v2_v9 = vld [vmem:[%s351_s0] sm:$0x1]   ;;  %v182_v10 = vld [vmem:[%s351_s0 + $0x12] sm:$0x1]   ;;  %s235_s7 = smov 57   ;;  %s236_s8 = smov 54  }
   0x6   :  { %13 = vrot.lane.b32.xlu0 %v174_v2, %s229_s16  ;;  %25 = vrot.lane.b32.xlu1 %v176_v3, %s230_s17  ;;  %4 = vst.msk [vmem:[#allocation0] sm:$0x1] %vm3_vm0, %v2_v9   ;;  %v183_v11 = vld [vmem:[%s351_s0 + $0x11] sm:$0x1]   ;;  %v184_v12 = vld [vmem:[%s351_s0 + $0x10] sm:$0x1]  }
   0x7   :  { %s237_s13 = smov 51   ;;  %s238_s14 = smov 48   ;;  %v185_v13 = vld [vmem:[%s351_s0 + $0xf] sm:$0x1]   ;;  %v186_v14 = vld [vmem:[%s351_s0 + $0xe] sm:$0x1]  }
   0x8   :  { %s239_s19 = smov 45   ;;  %s240_s20 = smov 42   ;;  %v187_v15 = vld [vmem:[%s351_s0 + $0xd] sm:$0x1]   ;;  %v188_v16 = vld [vmem:[%s351_s0 + $0xc] sm:$0x1]  }
   0x9   :  { %s241_s25 = smov 39   ;;  %s242_s26 = smov 36   ;;  %v189_v17 = vld [vmem:[%s351_s0 + $0xb] sm:$0x1]   ;;  %v190_v18 = vld [vmem:[%s351_s0 + $0xa] sm:$0x1]  }
   0xa   :  { %31 = vrot.lane.b32.xlu0 %v177_v4, %s231_s22  ;;  %37 = vrot.lane.b32.xlu1 %v178_v5, %s232_s23  ;;  %s243_s2 = smov 33   ;;  %s244_s3 = smov 30   ;;  %v191_v19 = vld [vmem:[%s351_s0 + $0x9] sm:$0x1]   ;;  %v192_v20 = vld [vmem:[%s351_s0 + $0x8] sm:$0x1]  }
   0xb   :  { %s246_s9 = smov 24   ;;  %v193_v21 = vld [vmem:[%s351_s0 + $0x7] sm:$0x1]   ;;  %v194_v22 = vld [vmem:[%s351_s0 + $0x6] sm:$0x1]   ;;  %s248_s15 = smov 18  }
   0xc   :  { %v195_v23 = vld [vmem:[%s351_s0 + $0x5] sm:$0x1]   ;;  %v196_v24 = vld [vmem:[%s351_s0 + $0x4] sm:$0x1]   ;;  %s250_s21 = smov 12   ;;  %s252_s27 = smov 6  }
   0xd   :  { %v197_v25 = vld [vmem:[%s351_s0 + $0x3] sm:$0x1]   ;;  %v198_v26 = vld [vmem:[%s351_s0 + $0x2] sm:$0x1]   ;;  %v199_v27 = vld [vmem:[%s351_s0 + $0x1] sm:$0x1]  }
   0xe   :  { %43 = vrot.lane.b32.xlu0 %v179_v6, %s233_s28  ;;  %49 = vrot.lane.b32.xlu1 %v180_v7, %s234_s29  ;;  %s253_s0 = smov 3   ;;  %vm27_vm4 = vcmask 613952   ;;  %vm33_vm5 = vcmask 589352   ;;  %vm39_vm6 = vcmask 564752   ;;  %vm45_vm7 = vcmask 540152  }
   0xf   :  { %vm51_vm8 = vcmask 515552   ;;  %vm57_vm9 = vcmask 490952   ;;  %vm63_vm10 = vcmask 466352   ;;  %vm69_vm11 = vcmask 441752  }
  0x10   :  { %vm75_vm12 = vcmask 417152   ;;  %vm81_vm13 = vcmask 392552   ;;  %vm87_vm14 = vcmask 367952   ;;  %vm93_vm15 = vcmask 343352  }
  0x11   :  { %vm99_vm0 = vcmask 318752  }
  0x12   :  { %55 = vrot.lane.b32.xlu0 %v181_v8, %s235_s7  ;;  %61 = vrot.lane.b32.xlu1 %v182_v10, %s236_s8  ;;  %s245_s8 = smov 27  }
  0x16   :  { %67 = vrot.lane.b32.xlu0 %v183_v11, %s237_s13  ;;  %73 = vrot.lane.b32.xlu1 %v184_v12, %s238_s14  ;;  %s247_s14 = smov 21  }
  0x1a   :  { %79 = vrot.lane.b32.xlu0 %v185_v13, %s239_s19  ;;  %85 = vrot.lane.b32.xlu1 %v186_v14, %s240_s20  ;;  %s249_s20 = smov 15  }
  0x1e   :  { %91 = vrot.lane.b32.xlu0 %v187_v15, %s241_s25  ;;  %97 = vrot.lane.b32.xlu1 %v188_v16, %s242_s26  ;;  %s251_s26 = smov 9  }
  0x22   :  { %103 = vrot.lane.b32.xlu0 %v189_v17, %s243_s2  ;;  %109 = vrot.lane.b32.xlu1 %v190_v18, %s244_s3 }
  0x26   :  { %115 = vrot.lane.b32.xlu0 %v191_v19, %s245_s8  ;;  %121 = vrot.lane.b32.xlu1 %v192_v20, %s246_s9 }
  0x2a   :  { %127 = vrot.lane.b32.xlu0 %v193_v21, %s247_s14  ;;  %133 = vrot.lane.b32.xlu1 %v194_v22, %s248_s15 }
  0x2e   :  { %139 = vrot.lane.b32.xlu0 %v195_v23, %s249_s20  ;;  %145 = vrot.lane.b32.xlu1 %v196_v24, %s250_s21 }
  0x32   :  { %151 = vrot.lane.b32.xlu0 %v197_v25, %s251_s26  ;;  %157 = vrot.lane.b32.xlu1 %v198_v26, %s252_s27 }
  0x36   :  { %163 = vrot.lane.b32.xlu0 %v199_v27, %s253_s0 }
  0x74   :  { %v8_v28 = vpop.permute.xlu0 %7   ;;  %v20_v29 = vpop.permute.xlu1 %19  }
  0x75   :  { %10 = vst.msk [vmem:[#allocation0] sm:$0x1] %vm9_vm1, %v8_v28   ;;  %vm105_vm1 = vcmask 294152  }
  0x78   :  { %v14_v30 = vpop.permute.xlu0 %13   ;;  %v26_v31 = vpop.permute.xlu1 %25  }
  0x79   :  { %16 = vst.msk [vmem:[#allocation0] sm:$0x1] %vm15_vm2, %v14_v30   ;;  %vm111_vm2 = vcmask 269552  }
  0x7a   :  { %22 = vst.msk [vmem:[#allocation0] sm:$0x1] %vm21_vm3, %v20_v29   ;;  %vm117_vm3 = vcmask 244952  }
  0x7b   :  { %28 = vst.msk [vmem:[#allocation0] sm:$0x1] %vm27_vm4, %v26_v31   ;;  %vm123_vm4 = vcmask 220352  }
  0x7c   :  { %v32_v32 = vpop.permute.xlu0 %31   ;;  %v38_v33 = vpop.permute.xlu1 %37  }
  0x7d   :  { %34 = vst.msk [vmem:[#allocation0] sm:$0x1] %vm33_vm5, %v32_v32   ;;  %vm129_vm5 = vcmask 195752  }
  0x7e   :  { %40 = vst.msk [vmem:[#allocation0] sm:$0x1] %vm39_vm6, %v38_v33   ;;  %vm135_vm6 = vcmask 171152  }
  0x80   :  { %v44_v34 = vpop.permute.xlu0 %43   ;;  %v50_v35 = vpop.permute.xlu1 %49  }
  0x81   :  { %46 = vst.msk [vmem:[#allocation0] sm:$0x1] %vm45_vm7, %v44_v34   ;;  %vm141_vm7 = vcmask 146552  }
  0x82   :  { %52 = vst.msk [vmem:[#allocation0] sm:$0x1] %vm51_vm8, %v50_v35   ;;  %vm147_vm8 = vcmask 121952  }
  0x84   :  { %v56_v36 = vpop.permute.xlu0 %55   ;;  %v62_v37 = vpop.permute.xlu1 %61  }
  0x85   :  { %58 = vst.msk [vmem:[#allocation0] sm:$0x1] %vm57_vm9, %v56_v36   ;;  %vm153_vm9 = vcmask 97352  }
  0x86   :  { %64 = vst.msk [vmem:[#allocation0] sm:$0x1] %vm63_vm10, %v62_v37   ;;  %vm159_vm10 = vcmask 72752  }
  0x88   :  { %v68_v38 = vpop.permute.xlu0 %67   ;;  %v74_v39 = vpop.permute.xlu1 %73  }
  0x89   :  { %70 = vst.msk [vmem:[#allocation0] sm:$0x1] %vm69_vm11, %v68_v38   ;;  %vm165_vm11 = vcmask 48152  }
  0x8a   :  { %76 = vst.msk [vmem:[#allocation0] sm:$0x1] %vm75_vm12, %v74_v39  }
  0x8c   :  { %v80_v40 = vpop.permute.xlu0 %79   ;;  %v86_v41 = vpop.permute.xlu1 %85  }
  0x8d   :  { %82 = vst.msk [vmem:[#allocation0] sm:$0x1] %vm81_vm13, %v80_v40  }
  0x8e   :  { %88 = vst.msk [vmem:[#allocation0] sm:$0x1] %vm87_vm14, %v86_v41  }
  0x90   :  { %v92_v42 = vpop.permute.xlu0 %91   ;;  %v98_v43 = vpop.permute.xlu1 %97  }
  0x91   :  { %94 = vst.msk [vmem:[#allocation0] sm:$0x1] %vm93_vm15, %v92_v42  }
  0x92   :  { %100 = vst.msk [vmem:[#allocation0] sm:$0x1] %vm99_vm0, %v98_v43  }
  0x94   :  { %v104_v44 = vpop.permute.xlu0 %103   ;;  %v110_v45 = vpop.permute.xlu1 %109  }
  0x95   :  { %106 = vst.msk [vmem:[#allocation0] sm:$0x1] %vm105_vm1, %v104_v44  }
  0x96   :  { %112 = vst.msk [vmem:[#allocation0] sm:$0x1] %vm111_vm2, %v110_v45  }
  0x98   :  { %v116_v46 = vpop.permute.xlu0 %115   ;;  %v122_v47 = vpop.permute.xlu1 %121  }
  0x99   :  { %118 = vst.msk [vmem:[#allocation0] sm:$0x1] %vm117_vm3, %v116_v46  }
  0x9a   :  { %124 = vst.msk [vmem:[#allocation0] sm:$0x1] %vm123_vm4, %v122_v47  }
  0x9c   :  { %v128_v48 = vpop.permute.xlu0 %127   ;;  %v134_v49 = vpop.permute.xlu1 %133  }
  0x9d   :  { %130 = vst.msk [vmem:[#allocation0] sm:$0x1] %vm129_vm5, %v128_v48  }
  0x9e   :  { %136 = vst.msk [vmem:[#allocation0] sm:$0x1] %vm135_vm6, %v134_v49  }
  0xa0   :  { %v140_v50 = vpop.permute.xlu0 %139   ;;  %v146_v51 = vpop.permute.xlu1 %145  }
  0xa1   :  { %142 = vst.msk [vmem:[#allocation0] sm:$0x1] %vm141_vm7, %v140_v50  }
  0xa2   :  { %148 = vst.msk [vmem:[#allocation0] sm:$0x1] %vm147_vm8, %v146_v51  }
  0xa4   :  { %v152_v52 = vpop.permute.xlu0 %151   ;;  %v158_v53 = vpop.permute.xlu1 %157  }
  0xa5   :  { %154 = vst.msk [vmem:[#allocation0] sm:$0x1] %vm153_vm9, %v152_v52  }
  0xa6   :  { %160 = vst.msk [vmem:[#allocation0] sm:$0x1] %vm159_vm10, %v158_v53  }
  0xa8   :  { %v164_v54 = vpop.permute.xlu0 %163  }
  0xa9   :  { %166 = vst.msk [vmem:[#allocation0] sm:$0x1] %vm165_vm11, %v164_v54  }
  0xb0   :  { %v170_v55 = vld [vmem:[#allocation0] sm:$0x1] }
  0xb1   :  { %172 = vst [vmem:[%s352_s1] sm:$0x1] %v170_v55 }

// kernel: tile.19
= control target key start
LH: loop header
LB: loop body
LE: loop exit
PB: predicated region body
PF: predicated region fallthrough
CT: control target
= control target key end

     0   :  { %s28_s0 = inlined_call_operand.vmem [shape: f32[8], index: 0, kind: input, shape index: {}]   ;;  %s29_s1 = inlined_call_operand.vmem [shape: f32[10,8], index: 1, kind: output, shape index: {}]  }
   0x1   :  { %v4_v0 = vld [vmem:[%s28_s0] ss:$0 sm:$0xff] }
   0x2   :  { %5 = vst [vmem:[%s29_s1] sm:$0xff] %v4_v0  ;;  %8 = vst [vmem:[%s29_s1 + $0x8] sm:$0xff] %v4_v0 }

// kernel: tile.20
= control target key start
LH: loop header
LB: loop body
LE: loop exit
PB: predicated region body
PF: predicated region fallthrough
CT: control target
= control target key end

     0   :  { %s83_s10 = smov 72   ;;  %s84_s11 = smov 56   ;;  %vm3_vm0 = vcmask 64512   ;;  %vm9_vm1 = vcmask 654912   ;;  %vm15_vm2 = vcmask 589312   ;;  %vm21_vm3 = vcmask 523712   ;;  %s135_s0 = inlined_call_operand.vmem [shape: f32[10,8], index: 0, kind: input, shape index: {}]   ;;  %s136_s1 = inlined_call_operand.vmem [shape: f32[1,80], index: 1, kind: output, shape index: {}]  }
   0x1   :  { %v65_v0 = vld [vmem:[%s135_s0 + $0x9] sm:$0x1]   ;;  %v67_v1 = vld [vmem:[%s135_s0 + $0x7] sm:$0x1]   ;;  %v66_v2 = vld [vmem:[%s135_s0 + $0x8] sm:$0x1]  }
   0x2   :  { %7 = vrot.lane.b32.xlu0 %v65_v0, %s83_s10  ;;  %19 = vrot.lane.b32.xlu1 %v67_v1, %s84_s11  ;;  %v68_v3 = vld [vmem:[%s135_s0 + $0x6] sm:$0x1]   ;;  %v2_v4 = vld [vmem:[%s135_s0] sm:$0x1]   ;;  %s85_s18 = smov 64   ;;  %s86_s19 = smov 48  }
   0x3   :  { %v69_v5 = vld [vmem:[%s135_s0 + $0x5] sm:$0x1]   ;;  %v70_v6 = vld [vmem:[%s135_s0 + $0x4] sm:$0x1]   ;;  %4 = vst.msk [vmem:[#allocation0] sm:$0x1] %vm3_vm0, %v2_v4  }
   0x4   :  { %s87_s24 = smov 40   ;;  %s88_s25 = smov 32   ;;  %v71_v7 = vld [vmem:[%s135_s0 + $0x3] sm:$0x1]   ;;  %v72_v8 = vld [vmem:[%s135_s0 + $0x2] sm:$0x1]  }
   0x5   :  { %s89_s30 = smov 24   ;;  %s90_s2 = smov 16   ;;  %v73_v9 = vld [vmem:[%s135_s0 + $0x1] sm:$0x1]   ;;  %vm27_vm4 = vcmask 458112   ;;  %vm33_vm5 = vcmask 392512  }
   0x6   :  { %13 = vrot.lane.b32.xlu0 %v66_v2, %s85_s18  ;;  %25 = vrot.lane.b32.xlu1 %v68_v3, %s86_s19  ;;  %s91_s0 = smov 8   ;;  %vm39_vm6 = vcmask 326912   ;;  %vm45_vm7 = vcmask 261312   ;;  %vm51_vm8 = vcmask 195712   ;;  %vm57_vm9 = vcmask 130112  }
   0xa   :  { %31 = vrot.lane.b32.xlu0 %v69_v5, %s87_s24  ;;  %37 = vrot.lane.b32.xlu1 %v70_v6, %s88_s25 }
   0xe   :  { %43 = vrot.lane.b32.xlu0 %v71_v7, %s89_s30  ;;  %49 = vrot.lane.b32.xlu1 %v72_v8, %s90_s2 }
  0x12   :  { %55 = vrot.lane.b32.xlu0 %v73_v9, %s91_s0 }
  0x74   :  { %v8_v10 = vpop.permute.xlu0 %7   ;;  %v20_v11 = vpop.permute.xlu1 %19  }
  0x75   :  { %10 = vst.msk [vmem:[#allocation0] sm:$0x1] %vm9_vm1, %v8_v10  }
  0x78   :  { %v14_v12 = vpop.permute.xlu0 %13   ;;  %v26_v13 = vpop.permute.xlu1 %25  }
  0x79   :  { %16 = vst.msk [vmem:[#allocation0] sm:$0x1] %vm15_vm2, %v14_v12  }
  0x7a   :  { %22 = vst.msk [vmem:[#allocation0] sm:$0x1] %vm21_vm3, %v20_v11  }
  0x7b   :  { %28 = vst.msk [vmem:[#allocation0] sm:$0x1] %vm27_vm4, %v26_v13  }
  0x7c   :  { %v32_v14 = vpop.permute.xlu0 %31   ;;  %v38_v15 = vpop.permute.xlu1 %37  }
  0x7d   :  { %34 = vst.msk [vmem:[#allocation0] sm:$0x1] %vm33_vm5, %v32_v14  }
  0x7e   :  { %40 = vst.msk [vmem:[#allocation0] sm:$0x1] %vm39_vm6, %v38_v15  }
  0x80   :  { %v44_v16 = vpop.permute.xlu0 %43   ;;  %v50_v17 = vpop.permute.xlu1 %49  }
  0x81   :  { %46 = vst.msk [vmem:[#allocation0] sm:$0x1] %vm45_vm7, %v44_v16  }
  0x82   :  { %52 = vst.msk [vmem:[#allocation0] sm:$0x1] %vm51_vm8, %v50_v17  }
  0x84   :  { %v56_v18 = vpop.permute.xlu0 %55  }
  0x85   :  { %58 = vst.msk [vmem:[#allocation0] sm:$0x1] %vm57_vm9, %v56_v18  }
  0x8c   :  { %v62_v19 = vld [vmem:[#allocation0] sm:$0x1] }
  0x8d   :  { %64 = vst [vmem:[%s136_s1] sm:$0x1] %v62_v19 }

// kernel: lenet5_forward.1
= control target key start
LH: loop header
LB: loop body
LE: loop exit
PB: predicated region body
PF: predicated region fallthrough
CT: control target
= control target key end

     0   :  { %s4453_s0 = inlined_call_operand.vmem [shape: f32[68,32], index: 0, kind: input, shape index: {}]   ;;  %s4454_s1 = inlined_call_operand.vmem [shape: f32[5,32,84], index: 1, kind: input, shape index: {}]   ;;  %s4455_s2 = inlined_call_operand.vmem [shape: f32[1,84], index: 2, kind: input, shape index: {}]   ;;  %s4456_s3 = inlined_call_operand.vmem [shape: f32[36,64], index: 3, kind: input, shape index: {}]   ;;  %s4457_s4 = inlined_call_operand.vmem [shape: f32[84,42], index: 4, kind: input, shape index: {}]   ;;  %s4458_s5 = inlined_call_operand.vmem [shape: f32[5,42,80], index: 5, kind: input, shape index: {}]   ;;  %s4459_s6 = inlined_call_operand.vmem [shape: f32[1,80], index: 6, kind: input, shape index: {}]   ;;  %s4460_s7 = inlined_call_operand.vmem [shape: f32[20,32], index: 7, kind: input, shape index: {}]   ;;  %s4461_s8 = inlined_call_operand.vmem [shape: f32[80,40], index: 8, kind: input, shape index: {}]   ;;  %s4462_s9 = inlined_call_operand.vmem [shape: f32[5,40,16], index: 9, kind: input, shape index: {}]   ;;  %s4463_s10 = inlined_call_operand.vmem [shape: f32[1,16], index: 10, kind: input, shape index: {}]   ;;  %s4464_s11 = inlined_call_operand.vmem [shape: f32[2,16], index: 11, kind: input, shape index: {}]   ;;  %s4465_s12 = inlined_call_operand.vmem [shape: f32[16,16], index: 12, kind: input, shape index: {}]   ;;  %s4466_s13 = inlined_call_operand.vmem [shape: f32[16,32], index: 13, kind: input, shape index: {}]   ;;  %s4467_s14 = inlined_call_operand.vmem [shape: f32[1,32], index: 14, kind: input, shape index: {}]   ;;  %s4468_s15 = inlined_call_operand.vmem [shape: f32[32,10], index: 15, kind: input, shape index: {}]   ;;  %s4469_s16 = inlined_call_operand.vmem [shape: f32[1,10], index: 16, kind: input, shape index: {}]   ;;  %s4470_s17 = inlined_call_operand.hbm [shape: f32[2,10], index: 17, kind: output, shape index: {}]  }
   0x1   :  { %4473 = sst [smem:[#allocation7_spill]] %s4453_s0 }
   0x2   :  { %4474 = sst [smem:[#allocation8_spill]] %s4454_s1 }
   0x3   :  { %s4475_s26 = sld [smem:[#allocation8_spill]]  ;;  %vm82_vm0 = vcmask 261120   ;;  %s4476_s20 = sld [smem:[#allocation7_spill]] }
   0x9   :  { %v2625_v0 = vld [vmem:[%s4475_s26 + $0x20] sm:$0xff]  ;;  %v2626_v1 = vld [vmem:[%s4475_s26 + $0x28] sm:$0xff]  ;;  %v2627_v2 = vld [vmem:[%s4475_s26 + $0x30] sm:$0xff] }
   0xa   :  { %v3395_v3 = vpack.c.bf16 %v2626_v1, %v2625_v0  ;;  %v2628_v4 = vld [vmem:[%s4475_s26 + $0x38] sm:$0xff]  ;;  %v69_v5 = vld [vmem:[%s4476_s20 + $0x1] sm:$0xff]  ;;  %v67_v10 = vld [vmem:[%s4475_s26 + $0x10] sm:$0xff] }
   0xb   :  { %v3399_v6 = vpack.c.bf16 %v2628_v4, %v2627_v2  ;;  %3002 = vmatprep.mubr.msk.f32.mxu0 %vm82_vm0, %v69_v5  ;;  %v65_v7 = vld [vmem:[%s4475_s26] sm:$0xff]  ;;  %v66_v8 = vld [vmem:[%s4475_s26 + $0x8] sm:$0xff]  ;;  %v68_v11 = vld [vmem:[%s4475_s26 + $0x18] sm:$0xff] }
   0xc   :  { %3396 = vmatprep.subr.bf16.mxu0 %v3395_v3  ;;  %v3403_v9 = vpack.c.bf16 %v66_v8, %v65_v7  ;;  %v70_v12 = vld [vmem:[%s4476_s20 + $0x9] sm:$0xff]  ;;  %v71_v13 = vld [vmem:[%s4476_s20 + $0x11] sm:$0xff]  ;;  %v3407_v14 = vpack.c.bf16 %v68_v11, %v67_v10  ;;  %v2645_v15 = vld [vmem:[%s4475_s26 + $0x40] sm:$0xff] }
   0xd   :  { %3398 = vmatpush3.bf16.msra.mxu0 %v3395_v3  ;;  %v2646_v16 = vld [vmem:[%s4475_s26 + $0x48] sm:$0xff]  ;;  %v72_v17 = vld [vmem:[%s4476_s20 + $0x19] sm:$0xff]  ;;  %v75_v21 = vld [vmem:[%s4476_s20 + $0x31] sm:$0xff] }
   0xe   :  { %3400 = vmatprep.subr.bf16.mxu0 %v3399_v6  ;;  %v73_v18 = vld [vmem:[%s4476_s20 + $0x21] sm:$0xff]  ;;  %v3411_v19 = vpack.c.bf16 %v2646_v16, %v2645_v15  ;;  %v74_v20 = vld [vmem:[%s4476_s20 + $0x29] sm:$0xff]  ;;  %v76_v22 = vld [vmem:[%s4476_s20 + $0x39] sm:$0xff] }
  0x11   :  { %3402 = vmatpush3.bf16.msra.mxu0 %v3399_v6 }
  0x12   :  { %3404 = vmatprep.subr.bf16.mxu0 %v3403_v9 }
  0x14   :  { %3003 = vmatmul.mubr.msk.f32.vlgmr.msra.gmra.mrb[0].mxu0 %vm82_vm0, %v70_v12 }
  0x15   :  { %3005 = vmatprep.mubr.msk.f32.mxu0 %vm82_vm0, %v71_v13  ;;  %3406 = vmatpush3.bf16.msra.mxu0 %v3403_v9 }
  0x16   :  { %3408 = vmatprep.subr.bf16.mxu0 %v3407_v14 }
  0x18   :  { %3006 = vmatmul.mubr.msk.f32.gmra.mrb[2].mxu0 %vm82_vm0, %v72_v17 }
  0x19   :  { %3008 = vmatprep.mubr.msk.f32.mxu0 %vm82_vm0, %v73_v18  ;;  %3410 = vmatpush3.bf16.msra.mxu0 %v3407_v14 }
  0x1a   :  { %3412 = vmatprep.subr.bf16.mxu0 %v3411_v19 }
  0x1c   :  { %3009 = vmatmul.mubr.msk.f32.gmra.mrb[4].mxu0 %vm82_vm0, %v74_v20 }
  0x1d   :  { %3011 = vmatprep.mubr.msk.f32.mxu0 %vm82_vm0, %v75_v21 }
  0x1e   :  { %22 = vsyncpa [#allocation5], 0  ;;  %v57_v23 = vld [vmem:[%s4476_s20] sm:$0xff]  ;;  %v2647_v24 = vld [vmem:[%s4475_s26 + $0x50] sm:$0xff]  ;;  %v3693_v6 = vmov 0.0|0.0   ;;  %vm3694_vm1 = vmmov 0  }
  0x1f   :  { %v2648_v25 = vld [vmem:[%s4475_s26 + $0x58] sm:$0xff]  ;;  %v58_v26 = vld [vmem:[%s4476_s20 + $0x8] sm:$0xff]  ;;  %v59_v27 = vld [vmem:[%s4476_s20 + $0x10] sm:$0xff]  ;;  %3435 = vmatprep.subr.bf16.mxu1 %v3693_v6  ;;  %v3695_v7 = vmov 0.0   ;;  %vm819_vm2 = vcmask 523264   ;;  %vm952_vm3 = vcmask 1043456  }
  0x20   :  { %3012 = vmatmul.mubr.msk.f32.gmra.mrb[6].mxu0 %vm82_vm0, %v76_v22  ;;  %v3415_v28 = vpack.c.bf16 %v2648_v25, %v2647_v24  ;;  %v2657_v29 = vld [vmem:[%s4475_s26 + $0x60] sm:$0xff]  ;;  %v2658_v30 = vld [vmem:[%s4475_s26 + $0x68] sm:$0xff]  ;;  %v60_v31 = vld [vmem:[%s4476_s20 + $0x18] sm:$0xff]  ;;  %3110 = vmatprep.mubr.msk.f32.mxu1 %vm3694_vm1, %v3695_v7  ;;  %vm936_vm4 = vcmask 687104   ;;  %vm1086_vm5 = vcmask 1041408   ;;  %vm3696_vm6 = vmmov 1  }
  0x21   :  { %3022 = vmatprep.mubr.msk.f32.mxu0 %vm82_vm0, %v57_v23  ;;  %v61_v32 = vld [vmem:[%s4476_s20 + $0x20] sm:$0xff]  ;;  %v3419_v33 = vpack.c.bf16 %v2658_v30, %v2657_v29  ;;  %v62_v34 = vld [vmem:[%s4476_s20 + $0x28] sm:$0xff]  ;;  %v63_v35 = vld [vmem:[%s4476_s20 + $0x30] sm:$0xff]  ;;  %vm1046_vm8 = vcmask 343040   ;;  %vm1051_vm9 = vcmask 338944   ;;  %vm1737_vm10 = vcmask 654336  }
  0x22   :  { %v64_v36 = vld [vmem:[%s4476_s20 + $0x38] sm:$0xff]  ;;  %v341_v37 = vld [vmem:[%s4476_s20 + $0x2] sm:$0xff]  ;;  %v2659_v38 = vld [vmem:[%s4475_s26 + $0x70] sm:$0xff]  ;;  %vm1827_vm11 = vcmask 326656   ;;  %vm1830_vm12 = vcmask 322560   ;;  %vm2294_vm13 = vcmask 130048  }
  0x23   :  { %v2660_v39 = vld [vmem:[%s4475_s26 + $0x78] sm:$0xff]  ;;  %v342_v40 = vld [vmem:[%s4476_s20 + $0xa] sm:$0xff]  ;;  %v2669_v43 = vld [vmem:[%s4475_s26 + $0x80] sm:$0xff]  ;;  %s3697_s22 = smov [#allocation4]   ;;  %vm2609_vm14 = vcmask 74752  }
  0x24   :  { %3023 = vmatmul.mubr.msk.f32.vlgmr.msra.gmra.mrb[0].mxu0 %vm82_vm0, %v58_v26  ;;  %v343_v41 = vld [vmem:[%s4476_s20 + $0x12] sm:$0xff]  ;;  %v3423_v42 = vpack.c.bf16 %v2660_v39, %v2659_v38  ;;  %v2670_v44 = vld [vmem:[%s4475_s26 + $0x88] sm:$0xff]  ;;  %v344_v45 = vld [vmem:[%s4476_s20 + $0x1a] sm:$0xff]  ;;  %s2617_s23 = sshll.u32 %s3697_s22, 4  ;;  %s2618_s23 = int_to_ptr.vmem [resolvable:$true] %s2617_s23 }
  0x25   :  { %3025 = vmatprep.mubr.msk.f32.mxu0 %vm82_vm0, %v59_v27  ;;  %3414 = vmatpush3.bf16.msra.mxu0 %v3411_v19  ;;  %v345_v46 = vld [vmem:[%s4476_s20 + $0x22] sm:$0xff]  ;;  %v3427_v47 = vpack.c.bf16 %v2670_v44, %v2669_v43  ;;  %v346_v48 = vld [vmem:[%s4476_s20 + $0x2a] sm:$0xff]  ;;  %v347_v49 = vld [vmem:[%s4476_s20 + $0x32] sm:$0xff]  ;;  %p3674_p1 = scmp.lt.s32.totalorder %s2618_s23, %s2618_s23 }
  0x26   :  { %3416 = vmatprep.subr.bf16.mxu0 %v3415_v28  ;;  %v348_v50 = vld [vmem:[%s4476_s20 + $0x3a] sm:$0xff]  ;;  %v491_v51 = vld [vmem:[%s4476_s20 + $0x3] sm:$0xff]  ;;  %v2671_v52 = vld [vmem:[%s4475_s26 + $0x90] sm:$0xff] }
  0x27   :  { %v2672_v53 = vld [vmem:[%s4475_s26 + $0x98] sm:$0xff]  ;;  %v492_v54 = vld [vmem:[%s4476_s20 + $0xb] sm:$0xff]  ;;  %v495_v58 = vld [vmem:[%s4476_s20 + $0x23] sm:$0xff] }
  0x28   :  { %3026 = vmatmul.mubr.msk.f32.gmra.mrb[2].mxu0 %vm82_vm0, %v60_v31  ;;  %v493_v55 = vld [vmem:[%s4476_s20 + $0x13] sm:$0xff]  ;;  %v3431_v56 = vpack.c.bf16 %v2672_v53, %v2671_v52  ;;  %v494_v57 = vld [vmem:[%s4476_s20 + $0x1b] sm:$0xff]  ;;  %v496_v59 = vld [vmem:[%s4476_s20 + $0x2b] sm:$0xff] }
  0x29   :  { %3028 = vmatprep.mubr.msk.f32.mxu0 %vm82_vm0, %v61_v32  ;;  %3418 = vmatpush3.bf16.msra.mxu0 %v3415_v28  ;;  %v497_v60 = vld [vmem:[%s4476_s20 + $0x33] sm:$0xff]  ;;  %v498_v61 = vld [vmem:[%s4476_s20 + $0x3b] sm:$0xff]  ;;  %v641_v62 = vld [vmem:[%s4476_s20 + $0x4] sm:$0xff] }
  0x2a   :  { %3420 = vmatprep.subr.bf16.mxu0 %v3419_v33  ;;  %v642_v63 = vld [vmem:[%s4476_s20 + $0xc] sm:$0xff]  ;;  %v643_v0 = vld [vmem:[%s4476_s20 + $0x14] sm:$0xff]  ;;  %v644_v1 = vld [vmem:[%s4476_s20 + $0x1c] sm:$0xff] }
  0x2b   :  { %v645_v2 = vld [vmem:[%s4476_s20 + $0x24] sm:$0xff]  ;;  %v646_v3 = vld [vmem:[%s4476_s20 + $0x2c] sm:$0xff]  ;;  %v647_v4 = vld [vmem:[%s4476_s20 + $0x34] sm:$0xff] }
  0x2c   :  { %3029 = vmatmul.mubr.msk.f32.gmra.mrb[4].mxu0 %vm82_vm0, %v62_v34  ;;  %v648_v5 = vld [vmem:[%s4476_s20 + $0x3c] sm:$0xff]  ;;  %v815_v43 = vld [vmem:[%s4456_s3 + $0x8] sm:$0xff]  ;;  %vm4129_vm7 = vmpackc.low %vm1086_vm5, %vm3696_vm6 }
  0x2d   :  { %3031 = vmatprep.mubr.msk.f32.mxu0 %vm82_vm0, %v63_v35  ;;  %v2681_v8 = vld [vmem:[%s4455_s2] ss:$0 sm:$0xff] }
  0x2e   :  { %v814_v39 = vld [vmem:[%s4456_s3] sm:$0xff] }
  0x2f   :  { %v933_v53 = vld [vmem:[%s4457_s4 + $0x40] sm:$0xff] }
  0x30   :  { %3032 = vmatmul.mubr.msk.f32.gmra.mrb[6].mxu0 %vm82_vm0, %v64_v36  ;;  %v925_v36 = vld [vmem:[%s4457_s4] sm:$0xff] }
  0x31   :  { %3042 = vmatprep.mubr.msk.f32.mxu0 %vm82_vm0, %v341_v37  ;;  %v926_v37 = vld [vmem:[%s4457_s4 + $0x8] sm:$0xff] }
  0x34   :  { %3043 = vmatmul.mubr.msk.f32.vlgmr.msra.gmra.mrb[0].mxu0 %vm82_vm0, %v342_v40  ;;  %v3448_v40 = vpack.c.bf16 %v926_v37, %v925_v36 }
  0x35   :  { %3045 = vmatprep.mubr.msk.f32.mxu0 %vm82_vm0, %v343_v41  ;;  %3422 = vmatpush3.bf16.msra.mxu0 %v3419_v33  ;;  %v927_v41 = vld [vmem:[%s4457_s4 + $0x10] sm:$0xff] }
  0x36   :  { %3424 = vmatprep.subr.bf16.mxu0 %v3423_v42 }
  0x38   :  { %3046 = vmatmul.mubr.msk.f32.gmra.mrb[2].mxu0 %vm82_vm0, %v344_v45  ;;  %v929_v45 = vld [vmem:[%s4457_s4 + $0x20] sm:$0xff] }
  0x39   :  { %3048 = vmatprep.mubr.msk.f32.mxu0 %vm82_vm0, %v345_v46  ;;  %3426 = vmatpush3.bf16.msra.mxu0 %v3423_v42  ;;  %v928_v42 = vld [vmem:[%s4457_s4 + $0x18] sm:$0xff]  ;;  %v930_v46 = vld [vmem:[%s4457_s4 + $0x28] sm:$0xff] }
  0x3a   :  { %3428 = vmatprep.subr.bf16.mxu0 %v3427_v47  ;;  %v3451_v44 = vpack.c.bf16 %v928_v42, %v927_v41  ;;  %v2714_v42 = vld [vmem:[%s4458_s5 + $0x88] sm:$0x3] }
  0x3c   :  { %3049 = vmatmul.mubr.msk.f32.gmra.mrb[4].mxu0 %vm82_vm0, %v346_v48  ;;  %v3454_v48 = vpack.c.bf16 %v930_v46, %v929_v45  ;;  %v2720_v45 = vld [vmem:[%s4458_s5 + $0x90] sm:$0xff] }
  0x3d   :  { %3051 = vmatprep.mubr.msk.f32.mxu0 %vm82_vm0, %v347_v49  ;;  %v931_v49 = vld [vmem:[%s4457_s4 + $0x30] sm:$0xff] }
  0x40   :  { %3052 = vmatmul.mubr.msk.f32.gmra.mrb[6].mxu0 %vm82_vm0, %v348_v50  ;;  %v932_v50 = vld [vmem:[%s4457_s4 + $0x38] sm:$0xff] }
  0x41   :  { %3062 = vmatprep.mubr.msk.f32.mxu0 %vm82_vm0, %v491_v51  ;;  %v817_v51 = vld [vmem:[%s4456_s3 + $0x18] sm:$0xff]  ;;  %v3457_v52 = vpack.c.bf16 %v932_v50, %v931_v49 }
  0x42   :  { %v2721_v49 = vld [vmem:[%s4458_s5 + $0x98] sm:$0xff] }
  0x44   :  { %3063 = vmatmul.mubr.msk.f32.vlgmr.msra.gmra.mrb[0].mxu0 %vm82_vm0, %v492_v54  ;;  %v934_v54 = vld [vmem:[%s4457_s4 + $0x48] sm:$0xff] }
  0x45   :  { %3065 = vmatprep.mubr.msk.f32.mxu0 %vm82_vm0, %v493_v55  ;;  %3430 = vmatpush3.bf16.msra.mxu0 %v3427_v47  ;;  %v816_v47 = vld [vmem:[%s4456_s3 + $0x10] sm:$0xff]  ;;  %v818_v55 = vld [vmem:[%s4456_s3 + $0x20] sm:$0xf] }
  0x46   :  { %3432 = vmatprep.subr.bf16.mxu0 %v3431_v56 }
  0x48   :  { %3066 = vmatmul.mubr.msk.f32.gmra.mrb[2].mxu0 %vm82_vm0, %v494_v57  ;;  %v935_v57 = vld [vmem:[%s4457_s4 + $0x50] sm:$0xf] }
  0x49   :  { %3068 = vmatprep.mubr.msk.f32.mxu0 %vm82_vm0, %v495_v58  ;;  %3434 = vmatpush3.bf16.msra.mxu0 %v3431_v56  ;;  %v3460_v56 = vpack.c.bf16 %v934_v54, %v933_v53 }
  0x4c   :  { %3069 = vmatmul.mubr.msk.f32.gmra.mrb[4].mxu0 %vm82_vm0, %v496_v59 }
  0x4d   :  { %3071 = vmatprep.mubr.msk.f32.mxu0 %vm82_vm0, %v497_v60 }
  0x50   :  { %3072 = vmatmul.mubr.msk.f32.gmra.mrb[6].mxu0 %vm82_vm0, %v498_v61 }
  0x51   :  { %3082 = vmatprep.mubr.msk.f32.mxu0 %vm82_vm0, %v641_v62 }
  0x54   :  { %3083 = vmatmul.mubr.msk.f32.vlgmr.msra.gmra.mrb[0].mxu0 %vm82_vm0, %v642_v63 }
  0x55   :  { %3085 = vmatprep.mubr.msk.f32.mxu0 %vm82_vm0, %v643_v0 }
  0x58   :  { %3086 = vmatmul.mubr.msk.f32.gmra.mrb[2].mxu0 %vm82_vm0, %v644_v1 }
  0x59   :  { %3088 = vmatprep.mubr.msk.f32.mxu0 %vm82_vm0, %v645_v2 }
  0x5c   :  { %3089 = vmatmul.mubr.msk.f32.gmra.mrb[4].mxu0 %vm82_vm0, %v646_v3 }
  0x5d   :  { %3091 = vmatprep.mubr.msk.f32.mxu0 %vm82_vm0, %v647_v4  ;;  %v1057_v4 = vld [vmem:[%s4458_s5] sm:$0xff] }
  0x60   :  { %3092 = vmatmul.mubr.msk.f32.gmra.mrb[6].mxu0 %vm82_vm0, %v648_v5  ;;  %v1058_v5 = vld [vmem:[%s4458_s5 + $0x8] sm:$0xff] }
 0x127   :  { %v3084_v9 = vpop.f32.mrb[0].mxu0 }
 0x128   :  { %v799_v10 = vadd.f32 %v3084_v9, %v2681_v8  ;;  %v744_v11 = vpop.f32.mrb[1].mxu0  ;;  %v1059_v9 = vld [vmem:[%s4458_s5 + $0x10] sm:$0xff] }
 0x129   :  { %v798_v12 = vadd.f32 %v2681_v8, %v744_v11 }
 0x12a   :  { %v807_v13 = vmax.f32 %v799_v10, 0.0  ;;  %v1060_v10 = vld [vmem:[%s4458_s5 + $0x18] sm:$0xff] }
 0x12b   :  { %v806_v14 = vmax.f32 %v798_v12, 0.0  ;;  %v3087_v15 = vpop.f32.mrb[2].mxu0  ;;  %v3480_v11 = vpack.c.bf16 %v1060_v10, %v1059_v9  ;;  %v2693_v12 = vld [vmem:[%s4458_s5 + $0x30] sm:$0xff] }
 0x12c   :  { %v801_v16 = vadd.f32 %v3087_v15, %v2681_v8  ;;  %v754_v17 = vpop.f32.mrb[3].mxu0  ;;  %v1061_v15 = vld [vmem:[%s4458_s5 + $0x20] sm:$0xff] }
 0x12d   :  { %v800_v18 = vadd.f32 %v2681_v8, %v754_v17  ;;  %v3436_v19 = vpack.c.bf16 %v807_v13, %v806_v14  ;;  %v2694_v13 = vld [vmem:[%s4458_s5 + $0x38] sm:$0xff] }
 0x12e   :  { %v809_v20 = vmax.f32 %v801_v16, 0.0  ;;  %v3462_v14 = vpack.c.bf16 %v2694_v13, %v2693_v12  ;;  %v1062_v16 = vld [vmem:[%s4458_s5 + $0x28] sm:$0x3] }
 0x12f   :  { %v808_v21 = vmax.f32 %v800_v18, 0.0  ;;  %v3090_v22 = vpop.f32.mrb[4].mxu0  ;;  %3437 = vmatpush3.bf16.msra.mxu1 %v3436_v19  ;;  %v3484_v17 = vpack.c.bf16 %v1062_v16, %v1061_v15  ;;  %v2695_v18 = vld [vmem:[%s4458_s5 + $0x40] sm:$0xff]  ;;  %v2696_v19 = vld [vmem:[%s4458_s5 + $0x48] sm:$0xff] }
 0x130   :  { %v803_v23 = vadd.f32 %v3090_v22, %v2681_v8  ;;  %v764_v24 = vpop.f32.mrb[5].mxu0  ;;  %3438 = vmatprep.subr.bf16.mxu1 %v3693_v6  ;;  %3463 = vmatprep.subr.bf16.mxu0 %v3462_v14  ;;  %v2709_v22 = vld [vmem:[%s4458_s5 + $0x60] sm:$0xff]  ;;  %v2736_v12 = vld [vmem:[%s4458_s5 + $0xe8] sm:$0x3] }
 0x131   :  { %v3439_v25 = vpack.c.bf16 %v809_v20, %v808_v21  ;;  %v802_v26 = vadd.f32 %v2681_v8, %v764_v24  ;;  %3465 = vmatpush3.bf16.msra.mxu0 %v3462_v14  ;;  %v3466_v21 = vpack.c.bf16 %v2696_v19, %v2695_v18 }
 0x132   :  { %v811_v27 = vmax.f32 %v803_v23, 0.0  ;;  %v2710_v23 = vld [vmem:[%s4458_s5 + $0x68] sm:$0xff] }
 0x133   :  { %v810_v28 = vmax.f32 %v802_v26, 0.0  ;;  %v3093_v29 = vpop.f32.mrb[6].mxu0  ;;  %3440 = vmatpush3.bf16.msra.mxu1 %v3439_v25  ;;  %3467 = vmatprep.subr.bf16.mxu0 %v3466_v21  ;;  %v3490_v24 = vpack.c.bf16 %v2710_v23, %v2709_v22  ;;  %v2697_v25 = vld [vmem:[%s4458_s5 + $0x50] sm:$0xff]  ;;  %v2698_v26 = vld [vmem:[%s4458_s5 + $0x58] sm:$0x3] }
 0x134   :  { %v805_v30 = vadd.f32 %v3093_v29, %v2681_v8  ;;  %v774_v31 = vpop.f32.mrb[7].mxu0  ;;  %3441 = vmatprep.subr.bf16.mxu1 %v3693_v6 }
 0x135   :  { %v3442_v32 = vpack.c.bf16 %v811_v27, %v810_v28  ;;  %v804_v33 = vadd.f32 %v2681_v8, %v774_v31  ;;  %v3476_v8 = vpack.c.bf16 %v1058_v5, %v1057_v4  ;;  %3469 = vmatpush3.bf16.msra.mxu0 %v3466_v21  ;;  %v3470_v27 = vpack.c.bf16 %v2698_v26, %v2697_v25  ;;  %v2733_v5 = vld [vmem:[%s4458_s5 + $0xd0] sm:$0xff]  ;;  %v2742_v26 = vld [vmem:[%s4459_s6] ss:$0 sm:$0xff] }
 0x136   :  { %v813_v34 = vmax.f32 %v805_v30, 0.0 }
 0x137   :  { %v812_v35 = vmax.f32 %v804_v33, 0.0  ;;  %3443 = vmatpush3.bf16.msra.mxu1 %v3442_v32  ;;  %3472 = vmatprep.subr.msk.bf16.mxu0 %vm4129_vm7, %v3470_v27 }
 0x138   :  { %3444 = vmatprep.subr.bf16.mxu1 %v3693_v6 }
 0x139   :  { %v3445_v38 = vpack.c.bf16 %v813_v34, %v812_v35  ;;  %3475 = vmatpush3.bf16.msk.msra.mxu0 %vm4129_vm7, %v3470_v27  ;;  %v2711_v34 = vld [vmem:[%s4458_s5 + $0x70] sm:$0xff]  ;;  %v2712_v35 = vld [vmem:[%s4458_s5 + $0x78] sm:$0xff] }
 0x13a   :  { %3532 = vmatprep.subr.bf16.mxu0 %v3693_v6  ;;  %v3494_v37 = vpack.c.bf16 %v2712_v35, %v2711_v34 }
 0x13b   :  { %3446 = vmatpush3.bf16.msra.mxu1 %v3445_v38  ;;  %v2713_v38 = vld [vmem:[%s4458_s5 + $0x80] sm:$0xff] }
 0x13c   :  { %3447 = vmatprep.subr.bf16.mxu1 %v3693_v6 }
 0x13e   :  { %3111 = vmatmul.mubr.msk.f32.vlgmr.msra.gmra.mrb[0].mxu1 %vm819_vm2, %v814_v39 }
 0x13f   :  { %3113 = vmatprep.mubr.msk.f32.mxu1 %vm3694_vm1, %v3695_v7  ;;  %3449 = vmatpush3.bf16.msra.mxu1 %v3448_v40 }
 0x140   :  { %3450 = vmatprep.subr.bf16.mxu1 %v3693_v6 }
 0x142   :  { %3114 = vmatmul.mubr.msk.f32.gmra.mrb[2].mxu1 %vm819_vm2, %v815_v43 }
 0x143   :  { %3116 = vmatprep.mubr.msk.f32.mxu1 %vm3694_vm1, %v3695_v7  ;;  %3452 = vmatpush3.bf16.msra.mxu1 %v3451_v44  ;;  %v3498_v44 = vpack.c.bf16 %v2714_v42, %v2713_v38  ;;  %v1727_v42 = vld [vmem:[%s4461_s8] sm:$0xff] }
 0x144   :  { %3453 = vmatprep.subr.bf16.mxu1 %v3693_v6 }
 0x146   :  { %3117 = vmatmul.mubr.msk.f32.gmra.mrb[4].mxu1 %vm819_vm2, %v816_v47 }
 0x147   :  { %3119 = vmatprep.mubr.msk.f32.mxu1 %vm3694_vm1, %v3695_v7  ;;  %3455 = vmatpush3.bf16.msra.mxu1 %v3454_v48 }
 0x148   :  { %3456 = vmatprep.subr.bf16.mxu1 %v3693_v6 }
 0x14a   :  { %3120 = vmatmul.mubr.msk.f32.gmra.mrb[6].mxu1 %vm819_vm2, %v817_v51  ;;  %v3504_v51 = vpack.c.bf16 %v2721_v49, %v2720_v45  ;;  %v1635_v45 = vld [vmem:[%s4460_s7] sm:$0xff]  ;;  %v1636_v49 = vld [vmem:[%s4460_s7 + $0x8] sm:$0xff] }
 0x14b   :  { %3122 = vmatprep.mubr.msk.f32.mxu1 %vm3694_vm1, %v3695_v7  ;;  %3458 = vmatpush3.bf16.msra.mxu1 %v3457_v52  ;;  %v2722_v52 = vld [vmem:[%s4458_s5 + $0xa0] sm:$0xff] }
 0x14c   :  { %3459 = vmatprep.subr.bf16.mxu1 %v3693_v6 }
 0x14e   :  { %3123 = vmatmul.mubr.msk.f32.gmra.mrb[8].mxu1 %vm819_vm2, %v818_v55  ;;  %v2723_v55 = vld [vmem:[%s4458_s5 + $0xa8] sm:$0xff] }
 0x14f   :  { %3461 = vmatpush3.bf16.msra.mxu1 %v3460_v56  ;;  %3147 = vmatprep.mubr.msk.f32.mxu1 %vm3694_vm1, %v3695_v7 }
 0x150   :  { %3145 = vmatprep.subr.mxu1 %v3695_v7 }
 0x153   :  { %3146 = vmatpush3.msk.msra.mxu1 %vm952_vm3, %v935_v57  ;;  %v3508_v57 = vpack.c.bf16 %v2723_v55, %v2722_v52  ;;  %v1732_v52 = vld [vmem:[%s4461_s8 + $0x28] sm:$0xff]  ;;  %v1733_v55 = vld [vmem:[%s4461_s8 + $0x30] sm:$0xff] }
 0x154   :  { %3477 = vmatprep.subr.bf16.mxu1 %v3476_v8 }
 0x211   :  { %v901_v58 = vpop.f32.mrb[0].mxu1 }
 0x212   :  { %v3112_v59 = vpop.f32.mrb[1].mxu1  ;;  %3148 = vmatmul.mubr.msk.f32.vlgmr.msra.gmra.mrb[10].mxu1 %vm936_vm4, %v901_v58  ;;  %v2724_v58 = vld [vmem:[%s4458_s5 + $0xb0] sm:$0xff] }
 0x213   :  { %3150 = vmatprep.mubr.msk.f32.mxu1 %vm3694_vm1, %v3695_v7  ;;  %3479 = vmatpush3.bf16.msra.mxu1 %v3476_v8  ;;  %v2734_v8 = vld [vmem:[%s4458_s5 + $0xd8] sm:$0xff] }
 0x214   :  { %3481 = vmatprep.subr.bf16.mxu1 %v3480_v11  ;;  %v3522_v9 = vpack.c.bf16 %v2734_v8, %v2733_v5  ;;  %v2751_v8 = vld [vmem:[%s4462_s9 + $0x38] sm:$0xff] }
 0x215   :  { %v906_v60 = vpop.f32.mrb[2].mxu1 }
 0x216   :  { %v3115_v61 = vpop.f32.mrb[3].mxu1  ;;  %3151 = vmatmul.mubr.msk.f32.gmra.mrb[12].mxu1 %vm936_vm4, %v906_v60 }
 0x217   :  { %3153 = vmatprep.mubr.msk.f32.mxu1 %vm3694_vm1, %v3695_v7  ;;  %3483 = vmatpush3.bf16.msra.mxu1 %v3480_v11  ;;  %v2725_v61 = vld [vmem:[%s4458_s5 + $0xb8] sm:$0x3]  ;;  %v2735_v11 = vld [vmem:[%s4458_s5 + $0xe0] sm:$0xff] }
 0x218   :  { %3486 = vmatprep.subr.msk.bf16.mxu1 %vm4129_vm7, %v3484_v17  ;;  %v3526_v14 = vpack.c.bf16 %v2736_v12, %v2735_v11  ;;  %v2753_v11 = vld [vmem:[%s4462_s9 + $0x48] sm:$0xff]  ;;  %v1834_v12 = vld [vmem:[%s4462_s9] sm:$0xff] }
 0x219   :  { %v911_v62 = vpop.f32.mrb[4].mxu1 }
 0x21a   :  { %v3118_v63 = vpop.f32.mrb[5].mxu1  ;;  %3154 = vmatmul.mubr.msk.f32.gmra.mrb[14].mxu1 %vm936_vm4, %v911_v62 }
 0x21b   :  { %3156 = vmatprep.mubr.msk.f32.mxu1 %vm3694_vm1, %v3695_v7  ;;  %3489 = vmatpush3.bf16.msk.msra.mxu1 %vm4129_vm7, %v3484_v17  ;;  %v3512_v63 = vpack.c.bf16 %v2725_v61, %v2724_v58  ;;  %v1735_v58 = vld [vmem:[%s4461_s8 + $0x40] sm:$0xff] }
 0x21c   :  { %3491 = vmatprep.subr.bf16.mxu1 %v3490_v24 }
 0x21d   :  { %v916_v0 = vpop.f32.mrb[6].mxu1 }
 0x21e   :  { %v3121_v1 = vpop.f32.mrb[7].mxu1  ;;  %3157 = vmatmul.mubr.msk.f32.gmra.mrb[16].mxu1 %vm936_vm4, %v916_v0 }
 0x21f   :  { %3159 = vmatprep.mubr.msk.f32.mxu1 %vm3694_vm1, %v3695_v7  ;;  %v2731_v1 = vld [vmem:[%s4458_s5 + $0xc0] sm:$0xff] }
 0x221   :  { %v921_v2 = vpop.f32.mrb[8].mxu1 }
 0x222   :  { %3160 = vmatmul.mubr.msk.f32.gmra.mrb[18].mxu1 %vm936_vm4, %v921_v2  ;;  %v3124_v3 = vpop.f32.mrb[9].mxu1  ;;  %v2732_v2 = vld [vmem:[%s4458_s5 + $0xc8] sm:$0xff] }
 0x223   :  { %v3518_v4 = vpack.c.bf16 %v2732_v2, %v2731_v1 }
 0x2e5   :  { %v1022_v28 = vpop.f32.mrb[10].mxu1 }
 0x2e6   :  { %1047 = vst.msk [vmem:[#allocation2] sm:$0xff] %vm1046_vm8, %v1022_v28  ;;  %v3149_v29 = vpop.f32.mrb[11].mxu1 }
 0x2e9   :  { %v1027_v30 = vpop.f32.mrb[12].mxu1 }
 0x2ea   :  { %1048 = vst.msk [vmem:[#allocation2 + $0x8] sm:$0xff] %vm1046_vm8, %v1027_v30  ;;  %v3152_v31 = vpop.f32.mrb[13].mxu1 }
 0x2ed   :  { %v1032_v32 = vpop.f32.mrb[14].mxu1  ;;  %v1053_v33 = vld [vmem:[#allocation2] sm:$0xff] }
 0x2ee   :  { %1049 = vst.msk [vmem:[#allocation2 + $0x10] sm:$0xff] %vm1046_vm8, %v1032_v32  ;;  %v3155_v36 = vpop.f32.mrb[15].mxu1  ;;  %3192 = vmatprep.mubr.msk.f32.mxu1 %vm1046_vm8, %v1053_v33 }
 0x2f1   :  { %v1037_v39 = vpop.f32.mrb[16].mxu1  ;;  %v1063_v40 = vld [vmem:[#allocation2 + $0x1] sm:$0xff] }
 0x2f2   :  { %v1054_v41 = vld [vmem:[#allocation2 + $0x8] sm:$0xff]  ;;  %1050 = vst.msk [vmem:[#allocation2 + $0x18] sm:$0xff] %vm1046_vm8, %v1037_v39  ;;  %v3158_v43 = vpop.f32.mrb[17].mxu1  ;;  %3174 = vmatprep.mubr.msk.f32.mxu0 %vm1046_vm8, %v1063_v40 }
 0x2f3   :  { %3193 = vmatmul.mubr.msk.f32.vlgmr.msra.gmra.mrb[20].mxu1 %vm1046_vm8, %v1054_v41  ;;  %v1275_v56 = vld [vmem:[#allocation2 + $0x2] sm:$0xff] }
 0x2f4   :  { %3493 = vmatpush3.bf16.msra.mxu1 %v3490_v24  ;;  %v1390_v3 = vld [vmem:[#allocation2 + $0x3] sm:$0xff] }
 0x2f5   :  { %3495 = vmatprep.subr.bf16.mxu1 %v3494_v37  ;;  %v1042_v46 = vpop.f32.mrb[18].mxu1  ;;  %v1064_v47 = vld [vmem:[#allocation2 + $0x9] sm:$0xff] }
 0x2f6   :  { %v1055_v48 = vld [vmem:[#allocation2 + $0x10] sm:$0xff]  ;;  %1052 = vst.msk [vmem:[#allocation2 + $0x20] sm:$0xf] %vm1051_vm9, %v1042_v46  ;;  %3175 = vmatmul.mubr.msk.f32.vlgmr.msra.gmra.mrb[8].mxu0 %vm1046_vm8, %v1064_v47  ;;  %v3161_v50 = vpop.f32.mrb[19].mxu1  ;;  %v1505_v16 = vld [vmem:[#allocation2 + $0x4] sm:$0xff] }
 0x2f7   :  { %3195 = vmatprep.mubr.msk.f32.mxu1 %vm1046_vm8, %v1055_v48  ;;  %v1276_v60 = vld [vmem:[#allocation2 + $0xa] sm:$0xff]  ;;  %v1730_v48 = vld [vmem:[%s4461_s8 + $0x18] sm:$0xff] }
 0x2f8   :  { %3497 = vmatpush3.bf16.msra.mxu1 %v3494_v37  ;;  %v1391_v10 = vld [vmem:[#allocation2 + $0xb] sm:$0xff] }
 0x2f9   :  { %3500 = vmatprep.subr.msk.bf16.mxu1 %vm4129_vm7, %v3498_v44  ;;  %v1065_v53 = vld [vmem:[#allocation2 + $0x11] sm:$0xff]  ;;  %v1728_v43 = vld [vmem:[%s4461_s8 + $0x8] sm:$0xff] }
 0x2fa   :  { %v1056_v54 = vld [vmem:[#allocation2 + $0x18] sm:$0xff]  ;;  %3177 = vmatprep.mubr.msk.f32.mxu0 %vm1046_vm8, %v1065_v53  ;;  %v1506_v17 = vld [vmem:[#allocation2 + $0xc] sm:$0xff]  ;;  %v3539_v46 = vpack.c.bf16 %v1728_v43, %v1727_v42 }
 0x2fb   :  { %3196 = vmatmul.mubr.msk.f32.gmra.mrb[22].mxu1 %vm1046_vm8, %v1056_v54  ;;  %v1277_v62 = vld [vmem:[#allocation2 + $0x12] sm:$0xff] }
 0x2fc   :  { %3503 = vmatpush3.bf16.msk.msra.mxu1 %vm4129_vm7, %v3498_v44  ;;  %3210 = vmatprep.mubr.msk.f32.mxu1 %vm1046_vm8, %v1275_v56  ;;  %v1392_v13 = vld [vmem:[#allocation2 + $0x13] sm:$0xff] }
 0x2fd   :  { %3505 = vmatprep.subr.bf16.mxu1 %v3504_v51  ;;  %v1066_v59 = vld [vmem:[#allocation2 + $0x19] sm:$0xff]  ;;  %v1729_v47 = vld [vmem:[%s4461_s8 + $0x10] sm:$0xff] }
 0x2fe   :  { %3178 = vmatmul.mubr.msk.f32.gmra.mrb[10].mxu0 %vm1046_vm8, %v1066_v59  ;;  %v1278_v0 = vld [vmem:[#allocation2 + $0x1a] sm:$0xff]  ;;  %v3542_v50 = vpack.c.bf16 %v1730_v48, %v1729_v47  ;;  %v1637_v53 = vld [vmem:[%s4460_s7 + $0x10] sm:$0xf]  ;;  %v1736_v59 = vld [vmem:[%s4461_s8 + $0x48] sm:$0xff] }
 0x2ff   :  { %3211 = vmatmul.mubr.msk.f32.vlgmr.msra.gmra.mrb[20].mxu1 %vm1046_vm8, %v1276_v60  ;;  %3260 = vmatprep.mubr.msk.f32.mxu0 %vm3694_vm1, %v3695_v7  ;;  %v1393_v15 = vld [vmem:[#allocation2 + $0x1b] sm:$0xff]  ;;  %v3551_v60 = vpack.c.bf16 %v1736_v59, %v1735_v58  ;;  %v2773_v47 = vld [vmem:[%s4462_s9 + $0xa8] sm:$0xff]  ;;  %v2774_v48 = vld [vmem:[%s4462_s9 + $0xb0] sm:$0xff] }
 0x300   :  { %3507 = vmatpush3.bf16.msra.mxu1 %v3504_v51  ;;  %3213 = vmatprep.mubr.msk.f32.mxu1 %vm1046_vm8, %v1277_v62  ;;  %v1507_v18 = vld [vmem:[#allocation2 + $0x14] sm:$0xff]  ;;  %v1508_v19 = vld [vmem:[#allocation2 + $0x1c] sm:$0xff] }
 0x301   :  { %3509 = vmatprep.subr.bf16.mxu1 %v3508_v57  ;;  %v1731_v51 = vld [vmem:[%s4461_s8 + $0x20] sm:$0xff]  ;;  %v1734_v56 = vld [vmem:[%s4461_s8 + $0x38] sm:$0xff] }
 0x302   :  { %v3545_v54 = vpack.c.bf16 %v1732_v52, %v1731_v51 }
 0x303   :  { %3214 = vmatmul.mubr.msk.f32.gmra.mrb[22].mxu1 %vm1046_vm8, %v1278_v0 }
 0x304   :  { %3511 = vmatpush3.bf16.msra.mxu1 %v3508_v57  ;;  %3228 = vmatprep.mubr.msk.f32.mxu1 %vm1046_vm8, %v1390_v3  ;;  %v3548_v57 = vpack.c.bf16 %v1734_v56, %v1733_v55  ;;  %v2749_v3 = vld [vmem:[%s4462_s9 + $0x28] sm:$0xff]  ;;  %v2779_v56 = vld [vmem:[%s4463_s10] ss:$0 sm:$0xff] }
 0x305   :  { %3514 = vmatprep.subr.msk.bf16.mxu1 %vm4129_vm7, %v3512_v63 }
 0x308   :  { %3517 = vmatpush3.bf16.msk.msra.mxu1 %vm4129_vm7, %v3512_v63 }
 0x309   :  { %3519 = vmatprep.subr.bf16.mxu1 %v3518_v4 }
 0x30b   :  { %3229 = vmatmul.mubr.msk.f32.vlgmr.msra.gmra.mrb[20].mxu1 %vm1046_vm8, %v1391_v10 }
 0x30c   :  { %3231 = vmatprep.mubr.msk.f32.mxu1 %vm1046_vm8, %v1392_v13  ;;  %3521 = vmatpush3.bf16.msra.mxu1 %v3518_v4  ;;  %v2750_v4 = vld [vmem:[%s4462_s9 + $0x30] sm:$0xff]  ;;  %v1835_v13 = vld [vmem:[%s4462_s9 + $0x8] sm:$0xff] }
 0x30d   :  { %3523 = vmatprep.subr.bf16.mxu1 %v3522_v9  ;;  %v3553_v5 = vpack.c.bf16 %v2750_v4, %v2749_v3  ;;  %v2443_v4 = vld [vmem:[%s4466_s13] sm:$0xff] }
 0x30f   :  { %3232 = vmatmul.mubr.msk.f32.gmra.mrb[22].mxu1 %vm1046_vm8, %v1393_v15 }
 0x310   :  { %3525 = vmatpush3.bf16.msra.mxu1 %v3522_v9  ;;  %3246 = vmatprep.mubr.msk.f32.mxu1 %vm1046_vm8, %v1505_v16  ;;  %v2752_v9 = vld [vmem:[%s4462_s9 + $0x40] sm:$0xff] }
 0x311   :  { %3528 = vmatprep.subr.msk.bf16.mxu1 %vm4129_vm7, %v3526_v14  ;;  %v3557_v10 = vpack.c.bf16 %v2752_v9, %v2751_v8 }
 0x314   :  { %3531 = vmatpush3.bf16.msk.msra.mxu1 %vm4129_vm7, %v3526_v14  ;;  %v3561_v14 = vpack.c.bf16 %v1835_v13, %v1834_v12  ;;  %v2526_v12 = vld [vmem:[%s4468_s15 + $0x8] sm:$0xff] }
 0x315   :  { %3554 = vmatprep.subr.bf16.mxu1 %v3553_v5 }
 0x317   :  { %3247 = vmatmul.mubr.msk.f32.vlgmr.msra.gmra.mrb[20].mxu1 %vm1046_vm8, %v1506_v17 }
 0x318   :  { %3249 = vmatprep.mubr.msk.f32.mxu1 %vm1046_vm8, %v1507_v18  ;;  %3556 = vmatpush3.bf16.msra.mxu1 %v3553_v5  ;;  %v2444_v5 = vld [vmem:[%s4466_s13 + $0x8] sm:$0xff] }
 0x319   :  { %3558 = vmatprep.subr.bf16.mxu1 %v3557_v10  ;;  %v3600_v8 = vpack.c.bf16 %v2444_v5, %v2443_v4 }
 0x31b   :  { %3250 = vmatmul.mubr.msk.f32.gmra.mrb[22].mxu1 %vm1046_vm8, %v1508_v19 }
 0x31c   :  { %3560 = vmatpush3.bf16.msra.mxu1 %v3557_v10 }
 0x31d   :  { %3306 = vmatprep.subr.mxu1 %v2753_v11 }
 0x320   :  { %3307 = vmatpush3.msra.mxu1 %v2753_v11  ;;  %v2525_v11 = vld [vmem:[%s4468_s15] sm:$0xff] }
 0x321   :  { %3562 = vmatprep.subr.bf16.mxu1 %v3561_v14  ;;  %v3603_v13 = vpack.c.bf16 %v2526_v12, %v2525_v11 }
 0x3c9   :  { %v3176_v21 = vpop.f32.mrb[8].mxu0 }
 0x3ca   :  { %v1156_v22 = vpop.f32.mrb[9].mxu0 }
 0x3d1   :  { %v3179_v23 = vpop.f32.mrb[10].mxu0 }
 0x3d2   :  { %v1166_v24 = vpop.f32.mrb[11].mxu0 }
 0x3ea   :  { %v3248_v25 = vpop.f32.mrb[20].mxu1 }
 0x3eb   :  { %v3608_v20 = vadd.f32 %v3248_v25, %v3176_v21  ;;  %v1597_v27 = vpop.f32.mrb[21].mxu1 }
 0x3ec   :  { %v3609_v28 = vadd.f32 %v1597_v27, %v1156_v22  ;;  %v1838_v27 = vld [vmem:[%s4462_s9 + $0x20] sm:$0xff] }
 0x3ed   :  { %v1628_v29 = vadd.f32 %v3608_v20, %v2742_v26 }
 0x3ee   :  { %v1627_v30 = vadd.f32 %v3609_v28, %v2742_v26  ;;  %v3251_v31 = vpop.f32.mrb[22].mxu1  ;;  %v2758_v28 = vld [vmem:[%s4462_s9 + $0x50] sm:$0xff] }
 0x3ef   :  { %v1632_v32 = vmax.f32 %v1628_v29, 0.0  ;;  %v3610_v33 = vadd.f32 %v3251_v31, %v3179_v23  ;;  %v1607_v34 = vpop.f32.mrb[23].mxu1  ;;  %v1836_v23 = vld [vmem:[%s4462_s9 + $0x10] sm:$0xff]  ;;  %v2759_v29 = vld [vmem:[%s4462_s9 + $0x58] sm:$0xff]  ;;  %v2761_v31 = vld [vmem:[%s4462_s9 + $0x68] sm:$0xff] }
 0x3f0   :  { %v1631_v35 = vmax.f32 %v1627_v30, 0.0  ;;  %v3611_v36 = vadd.f32 %v1607_v34, %v1166_v24  ;;  %v1837_v24 = vld [vmem:[%s4462_s9 + $0x18] sm:$0xff]  ;;  %v2760_v30 = vld [vmem:[%s4462_s9 + $0x60] sm:$0xff] }
 0x3f1   :  { %v1630_v37 = vadd.f32 %v3610_v33, %v2742_v26  ;;  %v3565_v25 = vpack.c.bf16 %v1837_v24, %v1836_v23  ;;  %v3573_v33 = vpack.c.bf16 %v2761_v31, %v2760_v30 }
 0x3f2   :  { %v3533_v38 = vpack.c.bf16 %v1632_v32, %v1631_v35  ;;  %v1629_v39 = vadd.f32 %v3611_v36, %v2742_v26  ;;  %v3569_v32 = vpack.c.bf16 %v2759_v29, %v2758_v28  ;;  %v2762_v36 = vld [vmem:[%s4462_s9 + $0x70] sm:$0xff] }
 0x3f3   :  { %v1634_v40 = vmax.f32 %v1630_v37, 0.0  ;;  %v2765_v37 = vld [vmem:[%s4462_s9 + $0x78] sm:$0xff] }
 0x3f4   :  { %v1633_v41 = vmax.f32 %v1629_v39, 0.0  ;;  %3534 = vmatpush3.bf16.msra.mxu0 %v3533_v38  ;;  %v2766_v38 = vld [vmem:[%s4462_s9 + $0x80] sm:$0xff]  ;;  %v2767_v39 = vld [vmem:[%s4462_s9 + $0x88] sm:$0xff] }
 0x3f5   :  { %3535 = vmatprep.subr.bf16.mxu0 %v3693_v6 }
 0x3f6   :  { %v3536_v44 = vpack.c.bf16 %v1634_v40, %v1633_v41  ;;  %v2768_v40 = vld [vmem:[%s4462_s9 + $0x90] sm:$0xff]  ;;  %v3577_v41 = vpack.c.bf16 %v2766_v38, %v2765_v37 }
 0x3f7   :  { %v3581_v42 = vpack.c.bf16 %v2768_v40, %v2767_v39 }
 0x3f8   :  { %3537 = vmatpush3.bf16.msra.mxu0 %v3536_v44 }
 0x3f9   :  { %3538 = vmatprep.subr.bf16.mxu0 %v3693_v6 }
 0x3fb   :  { %3261 = vmatmul.mubr.msk.f32.vlgmr.msra.gmra.mrb[12].mxu0 %vm82_vm0, %v1635_v45  ;;  %v2769_v45 = vld [vmem:[%s4462_s9 + $0x98] sm:$0xff] }
 0x3fc   :  { %3263 = vmatprep.mubr.msk.f32.mxu0 %vm3694_vm1, %v3695_v7  ;;  %3540 = vmatpush3.bf16.msra.mxu0 %v3539_v46  ;;  %v2772_v46 = vld [vmem:[%s4462_s9 + $0xa0] sm:$0xff] }
 0x3fd   :  { %3541 = vmatprep.subr.bf16.mxu0 %v3693_v6 }
 0x3ff   :  { %3264 = vmatmul.mubr.msk.f32.gmra.mrb[14].mxu0 %vm82_vm0, %v1636_v49  ;;  %v2775_v49 = vld [vmem:[%s4462_s9 + $0xb8] sm:$0xff] }
 0x400   :  { %3266 = vmatprep.mubr.msk.f32.mxu0 %vm3694_vm1, %v3695_v7  ;;  %3543 = vmatpush3.bf16.msra.mxu0 %v3542_v50  ;;  %v3585_v50 = vpack.c.bf16 %v2773_v47, %v2772_v46  ;;  %v3589_v51 = vpack.c.bf16 %v2775_v49, %v2774_v48 }
 0x401   :  { %3544 = vmatprep.subr.bf16.mxu0 %v3693_v6 }
 0x403   :  { %3267 = vmatmul.mubr.msk.f32.gmra.mrb[16].mxu0 %vm82_vm0, %v1637_v53 }
 0x404   :  { %3546 = vmatpush3.bf16.msra.mxu0 %v3545_v54  ;;  %3289 = vmatprep.mubr.msk.f32.mxu0 %vm3694_vm1, %v3695_v7  ;;  %v2776_v54 = vld [vmem:[%s4462_s9 + $0xc0] sm:$0xff] }
 0x405   :  { %3547 = vmatprep.subr.bf16.mxu0 %v3693_v6 }
 0x408   :  { %3549 = vmatpush3.bf16.msra.mxu0 %v3548_v57 }
 0x409   :  { %3550 = vmatprep.subr.bf16.mxu0 %v3693_v6 }
 0x40c   :  { %3552 = vmatpush3.bf16.msra.mxu0 %v3551_v60 }
 0x40d   :  { %3593 = vmatprep.subr.bf16.mxu0 %v3693_v6 }
 0x4ce   :  { %v1713_v61 = vpop.f32.mrb[12].mxu0 }
 0x4cf   :  { %v3262_v62 = vpop.f32.mrb[13].mxu0  ;;  %3290 = vmatmul.mubr.msk.f32.vlgmr.msra.gmra.mrb[18].mxu0 %vm1737_vm10, %v1713_v61 }
 0x4d0   :  { %3292 = vmatprep.mubr.msk.f32.mxu0 %vm3694_vm1, %v3695_v7 }
 0x4d2   :  { %v1718_v63 = vpop.f32.mrb[14].mxu0 }
 0x4d3   :  { %v3265_v0 = vpop.f32.mrb[15].mxu0  ;;  %3293 = vmatmul.mubr.msk.f32.gmra.mrb[20].mxu0 %vm1737_vm10, %v1718_v63  ;;  %v2368_v63 = vld [vmem:[%s4465_s12] sm:$0xff] }
 0x4d4   :  { %3295 = vmatprep.mubr.msk.f32.mxu0 %vm3694_vm1, %v3695_v7  ;;  %v2369_v0 = vld [vmem:[%s4465_s12 + $0x8] sm:$0xff] }
 0x4d5   :  { %v3597_v3 = vpack.c.bf16 %v2369_v0, %v2368_v63 }
 0x4d6   :  { %v1723_v1 = vpop.f32.mrb[16].mxu0 }
 0x4d7   :  { %v3268_v2 = vpop.f32.mrb[17].mxu0  ;;  %3296 = vmatmul.mubr.msk.f32.gmra.mrb[22].mxu0 %vm1737_vm10, %v1723_v1 }
 0x4d8   :  { %3367 = vmatprep.mubr.msk.f32.mxu0 %vm3694_vm1, %v3695_v7  ;;  %v2293_v2 = vld [vmem:[%s4464_s11] sm:$0x3] }
 0x5a2   :  { %v1813_v15 = vpop.f32.mrb[18].mxu0 }
 0x5a3   :  { %1828 = vst.msk [vmem:[#allocation3] sm:$0xff] %vm1827_vm11, %v1813_v15  ;;  %v3291_v16 = vpop.f32.mrb[19].mxu0 }
 0x5a4   :  { %v2527_v16 = vld [vmem:[%s4468_s15 + $0x10] sm:$0xff] }
 0x5a6   :  { %v1818_v17 = vpop.f32.mrb[20].mxu0 }
 0x5a7   :  { %1829 = vst.msk [vmem:[#allocation3 + $0x8] sm:$0xff] %vm1827_vm11, %v1818_v17  ;;  %v3294_v18 = vpop.f32.mrb[21].mxu0  ;;  %v2528_v17 = vld [vmem:[%s4468_s15 + $0x18] sm:$0xff]  ;;  %s3669_s15 = scalar_lea.vmem %s2618_s23, 32 }
 0x5a8   :  { %v3606_v18 = vpack.c.bf16 %v2528_v17, %v2527_v16  ;;  %p3670_p0 = scmp.ne.s32.totalorder %s2618_s23, %s3669_s15  ;;  %p3675_p2 = scmp.lt.s32.totalorder %s3669_s15, %s3669_s15 }
 0x5aa   :  { %v1823_v19 = vpop.f32.mrb[22].mxu0  ;;  %v1832_v20 = vld [vmem:[#allocation3] sm:$0xff]  ;;  %p3676_p3 = por %p3675_p2, %p3674_p1 }
 0x5ab   :  { %1831 = vst.msk [vmem:[#allocation3 + $0x10] sm:$0xf] %vm1830_vm12, %v1823_v19  ;;  %v3297_v21 = vpop.f32.mrb[23].mxu0  ;;  %v2782_v19 = vld [vmem:[%s4467_s14] ss:$0 sm:$0xff] }
 0x5ac   :  { %p3677_p4 = pnand %p3676_p3, %p3670_p0 }
 0x5ae   :  { %v1839_v22 = vld [vmem:[#allocation3 + $0x1] sm:$0xff] }
 0x5af   :  { %3308 = vmatprep.mubr.msk.f32.mxu1 %vm1827_vm11, %v1839_v22  ;;  %v1833_v34 = vld [vmem:[#allocation3 + $0x8] sm:$0xff] }
 0x5b0   :  { %v2009_v35 = vld [vmem:[#allocation3 + $0x2] sm:$0xff] }
 0x5b1   :  { %v2100_v44 = vld [vmem:[#allocation3 + $0x3] sm:$0xff] }
 0x5b2   :  { %v1840_v26 = vld [vmem:[#allocation3 + $0x9] sm:$0xff] }
 0x5b3   :  { %3309 = vmatmul.mubr.msk.f32.vlgmr.msra.gmra.mrb[24].mxu1 %vm1827_vm11, %v1840_v26  ;;  %v2010_v43 = vld [vmem:[#allocation3 + $0xa] sm:$0xff] }
 0x5b4   :  { %3564 = vmatpush3.bf16.msra.mxu1 %v3561_v14  ;;  %3321 = vmatprep.mubr.msk.f32.mxu1 %vm1827_vm11, %v1832_v20  ;;  %v2101_v52 = vld [vmem:[#allocation3 + $0xb] sm:$0xff] }
 0x5b5   :  { %3566 = vmatprep.subr.bf16.mxu1 %v3565_v25  ;;  %v2191_v53 = vld [vmem:[#allocation3 + $0x4] sm:$0xff]  ;;  %v2192_v55 = vld [vmem:[#allocation3 + $0xc] sm:$0xff] }
 0x5b8   :  { %3568 = vmatpush3.bf16.msra.mxu1 %v3565_v25 }
 0x5b9   :  { %3319 = vmatprep.subr.mxu1 %v1838_v27 }
 0x5bc   :  { %3320 = vmatpush3.msra.mxu1 %v1838_v27 }
 0x5bd   :  { %3322 = vmatmul.mubr.msk.f32.vlgmr.msra.gmra.mrb[24].mxu1 %vm1827_vm11, %v1833_v34  ;;  %3570 = vmatprep.subr.bf16.mxu1 %v3569_v32 }
 0x5be   :  { %3572 = vmatpush3.bf16.msra.mxu1 %v3569_v32  ;;  %3334 = vmatprep.mubr.msk.f32.mxu1 %vm1827_vm11, %v2009_v35 }
 0x5bf   :  { %3574 = vmatprep.subr.bf16.mxu1 %v3573_v33 }
 0x5c2   :  { %3576 = vmatpush3.bf16.msra.mxu1 %v3573_v33 }
 0x5c3   :  { %3332 = vmatprep.subr.mxu1 %v2762_v36 }
 0x5c6   :  { %3333 = vmatpush3.msra.mxu1 %v2762_v36 }
 0x5c7   :  { %3335 = vmatmul.mubr.msk.f32.vlgmr.msra.gmra.mrb[24].mxu1 %vm1827_vm11, %v2010_v43  ;;  %3578 = vmatprep.subr.bf16.mxu1 %v3577_v41 }
 0x5c8   :  { %3580 = vmatpush3.bf16.msra.mxu1 %v3577_v41  ;;  %3347 = vmatprep.mubr.msk.f32.mxu1 %vm1827_vm11, %v2100_v44 }
 0x5c9   :  { %3582 = vmatprep.subr.bf16.mxu1 %v3581_v42 }
 0x5cc   :  { %3584 = vmatpush3.bf16.msra.mxu1 %v3581_v42 }
 0x5cd   :  { %3345 = vmatprep.subr.mxu1 %v2769_v45 }
 0x5d0   :  { %3346 = vmatpush3.msra.mxu1 %v2769_v45 }
 0x5d1   :  { %3348 = vmatmul.mubr.msk.f32.vlgmr.msra.gmra.mrb[24].mxu1 %vm1827_vm11, %v2101_v52  ;;  %3586 = vmatprep.subr.bf16.mxu1 %v3585_v50 }
 0x5d2   :  { %3588 = vmatpush3.bf16.msra.mxu1 %v3585_v50  ;;  %3360 = vmatprep.mubr.msk.f32.mxu1 %vm1827_vm11, %v2191_v53 }
 0x5d3   :  { %3590 = vmatprep.subr.bf16.mxu1 %v3589_v51 }
 0x5d6   :  { %3592 = vmatpush3.bf16.msra.mxu1 %v3589_v51 }
 0x5d7   :  { %3358 = vmatprep.subr.mxu1 %v2776_v54 }
 0x5da   :  { %3359 = vmatpush3.msra.mxu1 %v2776_v54 }
 0x5db   :  { %3361 = vmatmul.mubr.msk.f32.vlgmr.msra.gmra.mrb[24].mxu1 %vm1827_vm11, %v2192_v55 }
 0x6ae   :  { %v3362_v57 = vpop.f32.mrb[24].mxu1 }
 0x6af   :  { %v2290_v58 = vadd.f32 %v3362_v57, %v2779_v56  ;;  %v2271_v59 = vpop.f32.mrb[25].mxu1 }
 0x6b0   :  { %v2289_v60 = vadd.f32 %v2779_v56, %v2271_v59 }
 0x6b1   :  { %v2292_v61 = vmax.f32 %v2290_v58, 0.0 }
 0x6b2   :  { %v2291_v62 = vmax.f32 %v2289_v60, 0.0 }
 0x6b4   :  { %v3594_v1 = vpack.c.bf16 %v2292_v61, %v2291_v62 }
 0x6b6   :  { %3595 = vmatpush3.bf16.msra.mxu0 %v3594_v1 }
 0x6b7   :  { %3596 = vmatprep.subr.bf16.mxu0 %v3693_v6 }
 0x6b9   :  { %3368 = vmatmul.mubr.msk.f32.vlgmr.msra.gmra.mrb[24].mxu0 %vm2294_vm13, %v2293_v2 }
 0x6ba   :  { %3598 = vmatpush3.bf16.msra.mxu0 %v3597_v3  ;;  %3374 = vmatprep.mubr.msk.f32.mxu0 %vm3694_vm1, %v3695_v7 }
 0x6bb   :  { %3599 = vmatprep.subr.bf16.mxu0 %v3693_v6 }
 0x78c   :  { %v2364_v9 = vpop.f32.mrb[24].mxu0 }
 0x78d   :  { %v3369_v10 = vpop.f32.mrb[25].mxu0  ;;  %3375 = vmatmul.mubr.msk.f32.vlgmr.msra.gmra.mrb[26].mxu0 %vm2294_vm13, %v2364_v9 }
 0x78e   :  { %3601 = vmatpush3.bf16.msra.mxu0 %v3600_v8  ;;  %3381 = vmatprep.mubr.msk.f32.mxu0 %vm3694_vm1, %v3695_v7 }
 0x78f   :  { %3602 = vmatprep.subr.bf16.mxu0 %v3693_v6 }
 0x860   :  { %v2439_v14 = vpop.f32.mrb[26].mxu0 }
 0x861   :  { %v3376_v15 = vpop.f32.mrb[27].mxu0  ;;  %3382 = vmatmul.mubr.msk.f32.vlgmr.msra.gmra.mrb[28].mxu0 %vm2294_vm13, %v2439_v14 }
 0x862   :  { %3604 = vmatpush3.bf16.msra.mxu0 %v3603_v13  ;;  %3392 = vmatprep.mubr.msk.f32.mxu0 %vm3694_vm1, %v3695_v7 }
 0x863   :  { %3605 = vmatprep.subr.bf16.mxu0 %v3693_v6  ;;  %v2784_v6 = vld [vmem:[%s4469_s16] ss:$0 sm:$0xff] }
 0x866   :  { %3607 = vmatpush3.bf16.msra.mxu0 %v3606_v18 }
 0x934   :  { %v2521_v21 = vpop.f32.mrb[28].mxu0 }
 0x935   :  { %v2522_v22 = vadd.f32 %v2782_v19, %v2521_v21  ;;  %v3383_v23 = vpop.f32.mrb[29].mxu0 }
 0x937   :  { %3393 = vmatmul.mubr.msk.f32.vlgmr.msra.gmra.mrb[30].mxu0 %vm82_vm0, %v2522_v22 }
 0xa0a   :  { %v2605_v7 = vpop.f32.mrb[30].mxu0 }
 0xa0b   :  { %v2606_v24 = vadd.f32 %v2784_v6, %v2605_v7  ;;  %v3394_v25 = vpop.f32.mrb[31].mxu0 }
 0xa0d   :  { %2610 = vst.msk [vmem:[#allocation4] sm:$0x3] %vm2609_vm14, %v2606_v24 }
 0xa0e   :  { %3680 = shalt.err (!%p3677_p4)
}
 0xa0f   :  { %s3681_s25 = scalar_lea.hbm %s4470_s17, 32 }
 0xa10   :  { %p3682_p5 = scmp.ne.s32.totalorder %s4470_s17, %s3681_s25  ;;  %p3685_p6 = scmp.lt.u32.totalorder %s3681_s25, %s4470_s17 }
 0xa12   :  { %p3687_p7 = pnand %p3685_p6, %p3682_p5 }
 0xa14   :  { %3690 = shalt.err (!%p3687_p7)
}
 0xa15   :  { %2620 = dma.vmem_to_hbm [thread:$0]  %s2618_s23, 32, %s4470_s17, [#allocation5]  }
 0xa16   :  { %3691 = dma.done.wait [#allocation5], 32  }
 0xa17   :  { %3692 = vsyncadd [#allocation5], 4294967264 }
 0xa18   :  { %2624 = vsyncpa [#allocation5], 1 }

</bundles_post_ra>
